<compile_context>
chip_gen: v5e
topology: v5e:2x2
jax: 0.10.0
libtpu: 0.0.40
codegen_flags: <defaults>
</compile_context>

<pallas_src>
import functools

import jax
import jax.numpy as jnp
from jax.experimental import pallas as pl
from jax.experimental.pallas import tpu as pltpu


# ---------------------------------------------------------------------------
# Fused Pallas kernel
# ---------------------------------------------------------------------------
# Layout contract (kept in sync with the P1 build in convnet_forward and the fc1
# row permutation in prepare_params):
#   * p1_ref rows are ordered (pool member (py,px), output-row parity e,
#     output-col parity f, i, j, n), i in [0,Ho2), j in [0,Wo2), n in [0,N);
#     columns are ordered (dy, dx, cin).
#   * After the pool-member max, h1 rows are (plane p=2e+f, i, j, n); each plane's
#     m2 = N*Ho2*Wo2 rows scatter contiguously into xp2s_ref (plane p holds padded-grid
#     positions with row parity 1-e / col parity 1-f; its halo ring stays zero).
#   * h2 rows are (i, j, n); fc1 consumes them position-major, which together with the
#     (ho2, wo2, c) row ordering of wf1 reproduces PyTorch's NCHW channel-major flatten.
def convnet_fused_kernel(
    p1_ref,        # (4*M1, 9*Cin)  bf16  stage-1 im2col, 4 pool members stacked on rows
    w1c_ref,       # (9*Cin, C1)    bf16  conv1 weight in GEMM form, K ordered (dy,dx,cin)
    b1c_ref,       # (1, C1)        f32
    w2c_ref,       # (9*C1, C2)     bf16  conv2 weight in GEMM form
    b2c_ref,       # (1, C2)        f32
    wf1_hbm_ref,   # (S*C2, 128)    bf16  fc1 weight, left in HBM (pl.ANY), rows (ho2,wo2,c)
    bf1_ref,       # (1, 128)       f32
    wf2_ref,       # (128, 128)     bf16  fc2 weight, output zero-padded to 128 lanes
    bf2_ref,       # (1, 128)       f32
    wf3_ref,       # (128, 8)       bf16  fc3 weight (rows >=84 and cols >=4 are zero)
    bf3_ref,       # (1, 8)         f32
    o_ref,         # (N, 8)         f32   padded logits (first 4 columns are real)
    xp2s_ref,      # (4, Ho2+1, (Wo2+1)*N, C1) f32 scratch: parity-split padded stage-1 out
    wf1_vmem_ref,  # (S*C2, 128)    bf16  scratch: landing buffer for the async fc1 weight
    wf1_sem,       # DMA semaphore
    *, n, ho2, wo2):
    c1 = w1c_ref.shape[1]
    c2 = w2c_ref.shape[1]
    m1 = p1_ref.shape[0] // 4          # N * Ho1 * Wo1
    m2 = n * ho2 * wo2                 # N * Ho2 * Wo2  (rows per parity plane)
    s_cnt = ho2 * wo2                  # spatial positions feeding fc1

    # Kick off the fc1-weight DMA now; it overlaps both conv stages and is only
    # waited on right before the fc1 matmuls.
    wf1_copy = pltpu.make_async_copy(wf1_hbm_ref, wf1_vmem_ref, wf1_sem)
    wf1_copy.start()

    # ---- Stage 1: conv1 as ONE GEMM over all 4 pool members, then pool-max+bias+ReLU
    # (relu(max_i a_i + b) == max_i relu(a_i + b)).
    r1 = jnp.dot(p1_ref[...], w1c_ref[...], preferred_element_type=jnp.float32)
    h1 = jnp.maximum(jnp.maximum(r1[0 * m1:1 * m1], r1[1 * m1:2 * m1]),
                     jnp.maximum(r1[2 * m1:3 * m1], r1[3 * m1:4 * m1]))
    h1 = jnp.maximum(h1 + b1c_ref[...], 0.0)      # (m1, c1), rows (plane, i, j, n)

    # ---- Scatter stage-1 output into the zero-padded, parity-decomposed scratch.
    # Only the one halo row and one halo col-strip per plane are left unwritten by
    # the interior scatter, so only those get zeroed.
    for e in range(2):
        for f in range(2):
            p = 2 * e + f
            zr = ho2 if e == 0 else 0          # halo row untouched by the scatter
            zg = wo2 if f == 0 else 0          # halo col-group untouched by the scatter
            xp2s_ref[p, zr:zr + 1, :, :] = jnp.zeros((1, (wo2 + 1) * n, c1), jnp.float32)
            xp2s_ref[p, :, zg * n:(zg + 1) * n, :] = jnp.zeros((ho2 + 1, n, c1), jnp.float32)
            blk = h1[p * m2:(p + 1) * m2].reshape(ho2, wo2 * n, c1)
            xp2s_ref[p, e:e + ho2, f * n:(f + wo2) * n, :] = blk

    # ---- Gather the 16 shifted views (u = py+dy, v = px+dx); each is (m2, c1), rows
    # (i, j, n).  Unit-stride static slices only, thanks to the parity split.
    blocks = {}
    for u in range(4):
        for v in range(4):
            p = 2 * (1 - u % 2) + (1 - v % 2)
            blk = xp2s_ref[p, u // 2:u // 2 + ho2,
                           (v // 2) * n:(v // 2 + wo2) * n, :]
            blocks[(u, v)] = blk.reshape(m2, c1).astype(jnp.bfloat16)

    # ---- Stage 2: register-resident accumulation of 9 offset GEMMs (no im2col
    # scratch, no narrow masked stores), then pool-max + bias + ReLU.
    r2 = jnp.zeros((4 * m2, c2), jnp.float32)
    for dy in range(3):
        for dx in range(3):
            o = 3 * dy + dx
            lhs = jnp.concatenate(
                [blocks[(py + dy, px + dx)] for py in range(2) for px in range(2)],
                axis=0)                                  # (4*m2, c1), rows (member,i,j,n)
            r2 = r2 + jnp.dot(lhs, w2c_ref[o * c1:(o + 1) * c1, :],
                              preferred_element_type=jnp.float32)
    h2 = jnp.maximum(jnp.maximum(r2[0 * m2:1 * m2], r2[1 * m2:2 * m2]),
                     jnp.maximum(r2[2 * m2:3 * m2], r2[3 * m2:4 * m2]))
    h2 = jnp.maximum(h2 + b2c_ref[...], 0.0)      # (m2, c2), rows (i, j, n)

    # ---- fc1: wait for the prefetched weight, then accumulate one (N,C2)x(C2,128)
    # GEMM per spatial position.  The flatten lives entirely in the weight-row slicing;
    # PyTorch's NCHW channel-major order was absorbed by wf1's row permutation.
    wf1_copy.wait()
    h2r = h2.reshape(s_cnt, n, c2)
    f1 = wf1_vmem_ref.shape[1]
    a1 = jnp.zeros((n, f1), jnp.float32)
    for s in range(s_cnt):
        a1 = a1 + jnp.dot(h2r[s].astype(jnp.bfloat16),
                          wf1_vmem_ref[s * c2:(s + 1) * c2, :],
                          preferred_element_type=jnp.float32)
    a1 = jnp.maximum(a1 + bf1_ref[...], 0.0)      # (n, 128)

    # ---- fc2 / fc3 (fc2 output zero-padded to 128 lanes, fc3 to 8 lanes).
    a2 = jnp.maximum(
        jnp.dot(a1.astype(jnp.bfloat16), wf2_ref[...],
                preferred_element_type=jnp.float32) + bf2_ref[...], 0.0)
    o_ref[...] = jnp.dot(a2.astype(jnp.bfloat16), wf3_ref[...],
                         preferred_element_type=jnp.float32) + bf3_ref[...]


# ---------------------------------------------------------------------------
# One-time parameter re-layout (outside the per-forward jit)
# ---------------------------------------------------------------------------
def prepare_params(params, img_size):
    """Re-layout the PyTorch-shaped parameters into kernel (GEMM, bf16) form once."""
    ho2 = wo2 = img_size // 4
    c1 = params["conv1_w"].shape[0]
    cin = params["conv1_w"].shape[1]
    c2 = params["conv2_w"].shape[0]
    f1 = params["fc1_w"].shape[0]
    f2 = params["fc2_w"].shape[0]
    f3 = params["fc3_w"].shape[0]
    s = ho2 * wo2
    assert params["fc1_w"].shape[1] == s * c2
    f3_pad = 8    # lane-pad the 4 logits to 8; the tiny (N,8) store is negligible

    w1c = jnp.transpose(params["conv1_w"], (2, 3, 1, 0)).reshape(9 * cin, c1)
    w2c = jnp.transpose(params["conv2_w"], (2, 3, 1, 0)).reshape(9 * c1, c2)
    # fc1: fold PyTorch's NCHW channel-major flatten into a weight-row permutation,
    # rows ordered (ho2, wo2, c) to match the kernel's position-major consumption.
    wf1 = (params["fc1_w"].reshape(f1, c2, ho2, wo2)
           .transpose(2, 3, 1, 0).reshape(s * c2, f1))
    wf2 = jnp.zeros((f1, 128), jnp.float32).at[:, :f2].set(params["fc2_w"].T)
    wf3 = jnp.zeros((128, f3_pad), jnp.float32).at[:f2, :f3].set(params["fc3_w"].T)
    return {
        "w1c": w1c.astype(jnp.bfloat16),
        "b1c": params["conv1_b"].reshape(1, c1).astype(jnp.float32),
        "w2c": w2c.astype(jnp.bfloat16),
        "b2c": params["conv2_b"].reshape(1, c2).astype(jnp.float32),
        "wf1": wf1.astype(jnp.bfloat16),
        "bf1": params["fc1_b"].reshape(1, f1).astype(jnp.float32),
        "wf2": wf2.astype(jnp.bfloat16),
        "bf2": jnp.zeros((1, 128), jnp.float32).at[:, :f2].set(params["fc2_b"]),
        "wf3": wf3.astype(jnp.bfloat16),
        "bf3": jnp.zeros((1, f3_pad), jnp.float32).at[:, :f3].set(params["fc3_b"]),
    }


# ---------------------------------------------------------------------------
# Wrapper: per-call stage-1 im2col + the fused pallas_call
# ---------------------------------------------------------------------------
def convnet_forward(x_nchw, prep, *, num_classes=4):
    N, Cin, H, W = x_nchw.shape
    assert H % 4 == 0 and W % 4 == 0, "spatial dims must be divisible by 4"
    Ho2, Wo2 = H // 4, W // 4
    K1 = prep["w1c"].shape[0]
    C1 = prep["w1c"].shape[1]
    assert K1 == 9 * Cin

    # Stage-1 im2col of the zero-padded input (columns ordered (dy, dx, cin)), rows
    # pre-ordered (pool member, parity e, parity f, i, j, n) — see the kernel's layout
    # contract.  TODO(synk): with Cin=3 an in-kernel stage-1 im2col is layout-hostile
    # (3-lane slices), so this small patch build stays in the wrapper, in bf16.
    x_nhwc = jnp.transpose(x_nchw, (0, 2, 3, 1))
    xp = jnp.pad(x_nhwc, ((0, 0), (1, 1), (1, 1), (0, 0)))
    cols = [xp[:, dy:dy + H, dx:dx + W, :] for dy in range(3) for dx in range(3)]
    PA = jnp.concatenate(cols, axis=-1)                     # (N, H, W, K1)
    PA = PA.reshape(N, Ho2, 2, 2, Wo2, 2, 2, K1)            # (n, i, e, py, j, f, px, K)
    P1 = PA.transpose(3, 6, 2, 5, 1, 4, 0, 7).reshape(4 * N * (H // 2) * (W // 2), K1)
    P1 = P1.astype(jnp.bfloat16)

    kernel = functools.partial(convnet_fused_kernel, n=N, ho2=Ho2, wo2=Wo2)
    vmem = pl.BlockSpec(memory_space=pltpu.MemorySpace.VMEM)
    hbm = pl.BlockSpec(memory_space=pl.ANY)   # fc1 weight: manual async copy in-kernel
    out = pl.pallas_call(
        kernel,
        out_shape=jax.ShapeDtypeStruct((N, prep["wf3"].shape[1]), jnp.float32),
        in_specs=[vmem, vmem, vmem, vmem, vmem, hbm, vmem, vmem, vmem, vmem, vmem],
        out_specs=vmem,
        scratch_shapes=[
            pltpu.VMEM((4, Ho2 + 1, (Wo2 + 1) * N, C1), jnp.float32),  # padded stage-1 out
            pltpu.VMEM(prep["wf1"].shape, prep["wf1"].dtype),          # fc1 weight buffer
            pltpu.SemaphoreType.DMA,                                   # its DMA semaphore
        ],
    )(P1, prep["w1c"], prep["b1c"], prep["w2c"], prep["b2c"], prep["wf1"],
      prep["bf1"], prep["wf2"], prep["bf2"], prep["wf3"], prep["bf3"])
    # NOTE: for large batches, tile the batch/M dimension with a "parallel" grid axis
    # (2 TensorCores on v7x) and size tiles against v7x's 64 MiB VMEM — not needed at N=2.
    return out[:, :num_classes]


# ---------------------------------------------------------------------------
# Pure-JAX references (float32 exact semantics, and a bf16-matmul-matched variant)
# ---------------------------------------------------------------------------
def _reference_forward(x_nchw, params, mm_dtype=jnp.float32):
    prec = (jax.lax.Precision.HIGHEST if mm_dtype == jnp.float32
            else jax.lax.Precision.DEFAULT)
    x = jnp.transpose(x_nchw, (0, 2, 3, 1))

    def stage(x, w, b):
        xp = jnp.pad(x, ((0, 0), (1, 1), (1, 1), (0, 0)))
        wk = jnp.transpose(w, (2, 3, 1, 0))                   # HWIO
        y = jax.lax.conv_general_dilated(
            xp.astype(mm_dtype), wk.astype(mm_dtype), (1, 1), "VALID",
            dimension_numbers=("NHWC", "HWIO", "NHWC"),
            precision=prec, preferred_element_type=jnp.float32)
        y = jnp.maximum(y + b, 0.0)
        n, h, w_, c = y.shape
        return y.reshape(n, h // 2, 2, w_ // 2, 2, c).max(axis=(2, 4))

    def dense(h, w, b, relu):
        y = jnp.dot(h.astype(mm_dtype), w.T.astype(mm_dtype),
                    precision=prec, preferred_element_type=jnp.float32) + b
        return jnp.maximum(y, 0.0) if relu else y

    h = stage(x, params["conv1_w"], params["conv1_b"])
    h = stage(h, params["conv2_w"], params["conv2_b"])
    n = h.shape[0]
    h = jnp.transpose(h, (0, 3, 1, 2)).reshape(n, -1)         # NCHW channel-major flatten
    h = dense(h, params["fc1_w"], params["fc1_b"], True)
    h = dense(h, params["fc2_w"], params["fc2_b"], True)
    return dense(h, params["fc3_w"], params["fc3_b"], False)


# ---------------------------------------------------------------------------
# Deterministic parameter initialization (shapes follow ConvNet.__init__)
# ---------------------------------------------------------------------------
def init_params(key, img_size):
    ks = jax.random.split(key, 10)
    feat = 4 * img_size * img_size
    s = 0.05
    return {
        "conv1_w": s * jax.random.normal(ks[0], (32, 3, 3, 3), jnp.float32),
        "conv1_b": s * jax.random.normal(ks[1], (32,), jnp.float32),
        "conv2_w": s * jax.random.normal(ks[2], (64, 32, 3, 3), jnp.float32),
        "conv2_b": s * jax.random.normal(ks[3], (64,), jnp.float32),
        "fc1_w": s * jax.random.normal(ks[4], (128, feat), jnp.float32),
        "fc1_b": s * jax.random.normal(ks[5], (128,), jnp.float32),
        "fc2_w": s * jax.random.normal(ks[6], (84, 128), jnp.float32),
        "fc2_b": s * jax.random.normal(ks[7], (84,), jnp.float32),
        "fc3_w": s * jax.random.normal(ks[8], (4, 84), jnp.float32),
        "fc3_b": s * jax.random.normal(ks[9], (4,), jnp.float32),
    }


if __name__ == "__main__":
    img_size = 16
    key = jax.random.PRNGKey(0)
    kx, kp = jax.random.split(key)
    x = jax.random.normal(kx, (2, 3, img_size, img_size), jnp.float32)  # NCHW
    params = init_params(kp, img_size)

    prep = prepare_params(params, img_size)          # one-time re-layout, outside jit
    fwd = jax.jit(convnet_forward)
    out = jax.block_until_ready(fwd(x, prep))
    assert out.shape == (2, 4) and out.dtype == jnp.float32

    # Tight check vs. a reference whose matmul inputs are cast to bf16 exactly like the
    # kernel's MXU inputs (catches layout/permutation bugs) ...
    ref_bf16 = _reference_forward(x, params, mm_dtype=jnp.bfloat16)
    err_bf16 = float(jnp.max(jnp.abs(out - ref_bf16)))
    assert jnp.allclose(out, ref_bf16, atol=2e-3, rtol=2e-3), (
        f"mismatch vs bf16-matched reference: max abs err {err_bf16}")
    # ... and a sanity check vs. the exact float32 semantics of the original module.
    ref_f32 = _reference_forward(x, params, mm_dtype=jnp.float32)
    err_f32 = float(jnp.max(jnp.abs(out - ref_f32)))
    assert jnp.allclose(out, ref_f32, atol=2e-2, rtol=2e-2), (
        f"mismatch vs float32 reference: max abs err {err_f32}")

    print("KERNEL_OK")
</pallas_src>

<mosaic_0001>
module attributes {stable_mosaic.version = 11 : i64} {
  func.func @convnet_fused_kernel(%arg0: memref<512x27xbf16, #tpu.memory_space<vmem>>, %arg1: memref<27x32xbf16, #tpu.memory_space<vmem>>, %arg2: memref<1x32xf32, #tpu.memory_space<vmem>>, %arg3: memref<288x64xbf16, #tpu.memory_space<vmem>>, %arg4: memref<1x64xf32, #tpu.memory_space<vmem>>, %arg5: memref<1024x128xbf16, #tpu.memory_space<any>>, %arg6: memref<1x128xf32, #tpu.memory_space<vmem>>, %arg7: memref<128x128xbf16, #tpu.memory_space<vmem>>, %arg8: memref<1x128xf32, #tpu.memory_space<vmem>>, %arg9: memref<128x8xbf16, #tpu.memory_space<vmem>>, %arg10: memref<1x8xf32, #tpu.memory_space<vmem>>, %arg11: memref<2x8xf32, #tpu.memory_space<vmem>>, %arg12: memref<4x5x10x32xf32, #tpu.memory_space<vmem>>, %arg13: memref<1024x128xbf16, #tpu.memory_space<vmem>>, %arg14: memref<!tpu.dma_semaphore, #tpu.memory_space<semaphore_mem>>) attributes {dimension_semantics = [], scalar_prefetch = 0 : i64, scratch_operands = 3 : i64, tpu.core_type = #tpu.core_type<tc>} {
    tpu.enqueue_dma source(%arg5 : memref<1024x128xbf16, #tpu.memory_space<any>>) target(%arg13 : memref<1024x128xbf16, #tpu.memory_space<vmem>>) target_semaphore(%arg14 : memref<!tpu.dma_semaphore, #tpu.memory_space<semaphore_mem>>)
    %c0 = arith.constant 0 : index
    %c0_0 = arith.constant 0 : index
    %0 = vector.load %arg0[%c0, %c0_0] : memref<512x27xbf16, #tpu.memory_space<vmem>>, vector<512x27xbf16>
    %c0_1 = arith.constant 0 : index
    %c0_2 = arith.constant 0 : index
    %1 = vector.load %arg1[%c0_1, %c0_2] : memref<27x32xbf16, #tpu.memory_space<vmem>>, vector<27x32xbf16>
    %cst = arith.constant dense<0.000000e+00> : vector<512x32xf32>
    %2 = tpu.matmul %0, %1, %cst {dimension_numbers = #tpu.dot_dimension_numbers<[1], [0], [0], [1], [0, 0, 1, 1], [], []>} : vector<512x27xbf16>, vector<27x32xbf16>, vector<512x32xf32> -> vector<512x32xf32>
    %3 = vector.extract_strided_slice %2 {offsets = [0, 0], sizes = [128, 32], strides = [1, 1]} : vector<512x32xf32> to vector<128x32xf32>
    %4 = vector.extract_strided_slice %2 {offsets = [128, 0], sizes = [128, 32], strides = [1, 1]} : vector<512x32xf32> to vector<128x32xf32>
    %5 = arith.maximumf %3, %4 : vector<128x32xf32>
    %6 = vector.extract_strided_slice %2 {offsets = [256, 0], sizes = [128, 32], strides = [1, 1]} : vector<512x32xf32> to vector<128x32xf32>
    %7 = vector.extract_strided_slice %2 {offsets = [384, 0], sizes = [128, 32], strides = [1, 1]} : vector<512x32xf32> to vector<128x32xf32>
    %8 = arith.maximumf %6, %7 : vector<128x32xf32>
    %9 = arith.maximumf %5, %8 : vector<128x32xf32>
    %c0_3 = arith.constant 0 : index
    %c0_4 = arith.constant 0 : index
    %10 = vector.load %arg2[%c0_3, %c0_4] : memref<1x32xf32, #tpu.memory_space<vmem>>, vector<1x32xf32>
    %11 = vector.broadcast %10 : vector<1x32xf32> to vector<128x32xf32>
    %12 = arith.addf %9, %11 : vector<128x32xf32>
    %cst_5 = arith.constant 0.000000e+00 : f32
    %13 = vector.broadcast %cst_5 : f32 to vector<128x32xf32>
    %14 = arith.maximumf %12, %13 : vector<128x32xf32>
    %cst_6 = arith.constant 0.000000e+00 : f32
    %15 = vector.broadcast %cst_6 : f32 to vector<1x10x32xf32>
    %c0_7 = arith.constant 0 : index
    %c4 = arith.constant 4 : index
    %c0_8 = arith.constant 0 : index
    %c0_9 = arith.constant 0 : index
    %16 = vector.load %arg12[%c0_7, %c4, %c0_8, %c0_9] : memref<4x5x10x32xf32, #tpu.memory_space<vmem>>, vector<1x1x10x32xf32>
    %17 = vector.shape_cast %16 : vector<1x1x10x32xf32> to vector<1x10x32xf32>
    %18 = vector.shape_cast %15 : vector<1x10x32xf32> to vector<1x1x10x32xf32>
    tpu.vector_store %arg12[%c0_7, %c4, %c0_8, %c0_9], %18 {strides = array<i32>} : memref<4x5x10x32xf32, #tpu.memory_space<vmem>>, vector<1x1x10x32xf32>,
    %cst_10 = arith.constant 0.000000e+00 : f32
    %19 = vector.broadcast %cst_10 : f32 to vector<5x2x32xf32>
    %c0_11 = arith.constant 0 : index
    %c0_12 = arith.constant 0 : index
    %c8 = arith.constant 8 : index
    %c0_13 = arith.constant 0 : index
    %20 = vector.load %arg12[%c0_11, %c0_12, %c8, %c0_13] : memref<4x5x10x32xf32, #tpu.memory_space<vmem>>, vector<1x5x2x32xf32>
    %21 = vector.shape_cast %20 : vector<1x5x2x32xf32> to vector<5x2x32xf32>
    %22 = vector.shape_cast %19 : vector<5x2x32xf32> to vector<1x5x2x32xf32>
    tpu.vector_store %arg12[%c0_11, %c0_12, %c8, %c0_13], %22 {strides = array<i32>} : memref<4x5x10x32xf32, #tpu.memory_space<vmem>>, vector<1x5x2x32xf32>,
    %23 = vector.extract_strided_slice %14 {offsets = [0, 0], sizes = [32, 32], strides = [1, 1]} : vector<128x32xf32> to vector<32x32xf32>
    %24 = vector.shape_cast %23 : vector<32x32xf32> to vector<4x8x32xf32>
    %c0_14 = arith.constant 0 : index
    %c0_15 = arith.constant 0 : index
    %c0_16 = arith.constant 0 : index
    %c0_17 = arith.constant 0 : index
    %25 = vector.load %arg12[%c0_14, %c0_15, %c0_16, %c0_17] : memref<4x5x10x32xf32, #tpu.memory_space<vmem>>, vector<1x4x8x32xf32>
    %26 = vector.shape_cast %25 : vector<1x4x8x32xf32> to vector<4x8x32xf32>
    %27 = vector.shape_cast %24 : vector<4x8x32xf32> to vector<1x4x8x32xf32>
    tpu.vector_store %arg12[%c0_14, %c0_15, %c0_16, %c0_17], %27 {strides = array<i32>} : memref<4x5x10x32xf32, #tpu.memory_space<vmem>>, vector<1x4x8x32xf32>,
    %cst_18 = arith.constant 0.000000e+00 : f32
    %28 = vector.broadcast %cst_18 : f32 to vector<1x10x32xf32>
    %c1 = arith.constant 1 : index
    %c4_19 = arith.constant 4 : index
    %c0_20 = arith.constant 0 : index
    %c0_21 = arith.constant 0 : index
    %29 = vector.load %arg12[%c1, %c4_19, %c0_20, %c0_21] : memref<4x5x10x32xf32, #tpu.memory_space<vmem>>, vector<1x1x10x32xf32>
    %30 = vector.shape_cast %29 : vector<1x1x10x32xf32> to vector<1x10x32xf32>
    %31 = vector.shape_cast %28 : vector<1x10x32xf32> to vector<1x1x10x32xf32>
    tpu.vector_store %arg12[%c1, %c4_19, %c0_20, %c0_21], %31 {strides = array<i32>} : memref<4x5x10x32xf32, #tpu.memory_space<vmem>>, vector<1x1x10x32xf32>,
    %cst_22 = arith.constant 0.000000e+00 : f32
    %32 = vector.broadcast %cst_22 : f32 to vector<5x2x32xf32>
    %c1_23 = arith.constant 1 : index
    %c0_24 = arith.constant 0 : index
    %c0_25 = arith.constant 0 : index
    %c0_26 = arith.constant 0 : index
    %33 = vector.load %arg12[%c1_23, %c0_24, %c0_25, %c0_26] : memref<4x5x10x32xf32, #tpu.memory_space<vmem>>, vector<1x5x2x32xf32>
    %34 = vector.shape_cast %33 : vector<1x5x2x32xf32> to vector<5x2x32xf32>
    %35 = vector.shape_cast %32 : vector<5x2x32xf32> to vector<1x5x2x32xf32>
    tpu.vector_store %arg12[%c1_23, %c0_24, %c0_25, %c0_26], %35 {strides = array<i32>} : memref<4x5x10x32xf32, #tpu.memory_space<vmem>>, vector<1x5x2x32xf32>,
    %36 = vector.extract_strided_slice %14 {offsets = [32, 0], sizes = [32, 32], strides = [1, 1]} : vector<128x32xf32> to vector<32x32xf32>
    %37 = vector.shape_cast %36 : vector<32x32xf32> to vector<4x8x32xf32>
    %c1_27 = arith.constant 1 : index
    %c0_28 = arith.constant 0 : index
    %c2 = arith.constant 2 : index
    %c0_29 = arith.constant 0 : index
    %38 = vector.load %arg12[%c1_27, %c0_28, %c2, %c0_29] : memref<4x5x10x32xf32, #tpu.memory_space<vmem>>, vector<1x4x8x32xf32>
    %39 = vector.shape_cast %38 : vector<1x4x8x32xf32> to vector<4x8x32xf32>
    %40 = vector.shape_cast %37 : vector<4x8x32xf32> to vector<1x4x8x32xf32>
    tpu.vector_store %arg12[%c1_27, %c0_28, %c2, %c0_29], %40 {strides = array<i32>} : memref<4x5x10x32xf32, #tpu.memory_space<vmem>>, vector<1x4x8x32xf32>,
    %cst_30 = arith.constant 0.000000e+00 : f32
    %41 = vector.broadcast %cst_30 : f32 to vector<1x10x32xf32>
    %c2_31 = arith.constant 2 : index
    %c0_32 = arith.constant 0 : index
    %c0_33 = arith.constant 0 : index
    %c0_34 = arith.constant 0 : index
    %42 = vector.load %arg12[%c2_31, %c0_32, %c0_33, %c0_34] : memref<4x5x10x32xf32, #tpu.memory_space<vmem>>, vector<1x1x10x32xf32>
    %43 = vector.shape_cast %42 : vector<1x1x10x32xf32> to vector<1x10x32xf32>
    %44 = vector.shape_cast %41 : vector<1x10x32xf32> to vector<1x1x10x32xf32>
    tpu.vector_store %arg12[%c2_31, %c0_32, %c0_33, %c0_34], %44 {strides = array<i32>} : memref<4x5x10x32xf32, #tpu.memory_space<vmem>>, vector<1x1x10x32xf32>,
    %cst_35 = arith.constant 0.000000e+00 : f32
    %45 = vector.broadcast %cst_35 : f32 to vector<5x2x32xf32>
    %c2_36 = arith.constant 2 : index
    %c0_37 = arith.constant 0 : index
    %c8_38 = arith.constant 8 : index
    %c0_39 = arith.constant 0 : index
    %46 = vector.load %arg12[%c2_36, %c0_37, %c8_38, %c0_39] : memref<4x5x10x32xf32, #tpu.memory_space<vmem>>, vector<1x5x2x32xf32>
    %47 = vector.shape_cast %46 : vector<1x5x2x32xf32> to vector<5x2x32xf32>
    %48 = vector.shape_cast %45 : vector<5x2x32xf32> to vector<1x5x2x32xf32>
    tpu.vector_store %arg12[%c2_36, %c0_37, %c8_38, %c0_39], %48 {strides = array<i32>} : memref<4x5x10x32xf32, #tpu.memory_space<vmem>>, vector<1x5x2x32xf32>,
    %49 = vector.extract_strided_slice %14 {offsets = [64, 0], sizes = [32, 32], strides = [1, 1]} : vector<128x32xf32> to vector<32x32xf32>
    %50 = vector.shape_cast %49 : vector<32x32xf32> to vector<4x8x32xf32>
    %c2_40 = arith.constant 2 : index
    %c1_41 = arith.constant 1 : index
    %c0_42 = arith.constant 0 : index
    %c0_43 = arith.constant 0 : index
    %51 = vector.load %arg12[%c2_40, %c1_41, %c0_42, %c0_43] : memref<4x5x10x32xf32, #tpu.memory_space<vmem>>, vector<1x4x8x32xf32>
    %52 = vector.shape_cast %51 : vector<1x4x8x32xf32> to vector<4x8x32xf32>
    %53 = vector.shape_cast %50 : vector<4x8x32xf32> to vector<1x4x8x32xf32>
    tpu.vector_store %arg12[%c2_40, %c1_41, %c0_42, %c0_43], %53 {strides = array<i32>} : memref<4x5x10x32xf32, #tpu.memory_space<vmem>>, vector<1x4x8x32xf32>,
    %cst_44 = arith.constant 0.000000e+00 : f32
    %54 = vector.broadcast %cst_44 : f32 to vector<1x10x32xf32>
    %c3 = arith.constant 3 : index
    %c0_45 = arith.constant 0 : index
    %c0_46 = arith.constant 0 : index
    %c0_47 = arith.constant 0 : index
    %55 = vector.load %arg12[%c3, %c0_45, %c0_46, %c0_47] : memref<4x5x10x32xf32, #tpu.memory_space<vmem>>, vector<1x1x10x32xf32>
    %56 = vector.shape_cast %55 : vector<1x1x10x32xf32> to vector<1x10x32xf32>
    %57 = vector.shape_cast %54 : vector<1x10x32xf32> to vector<1x1x10x32xf32>
    tpu.vector_store %arg12[%c3, %c0_45, %c0_46, %c0_47], %57 {strides = array<i32>} : memref<4x5x10x32xf32, #tpu.memory_space<vmem>>, vector<1x1x10x32xf32>,
    %cst_48 = arith.constant 0.000000e+00 : f32
    %58 = vector.broadcast %cst_48 : f32 to vector<5x2x32xf32>
    %c3_49 = arith.constant 3 : index
    %c0_50 = arith.constant 0 : index
    %c0_51 = arith.constant 0 : index
    %c0_52 = arith.constant 0 : index
    %59 = vector.load %arg12[%c3_49, %c0_50, %c0_51, %c0_52] : memref<4x5x10x32xf32, #tpu.memory_space<vmem>>, vector<1x5x2x32xf32>
    %60 = vector.shape_cast %59 : vector<1x5x2x32xf32> to vector<5x2x32xf32>
    %61 = vector.shape_cast %58 : vector<5x2x32xf32> to vector<1x5x2x32xf32>
    tpu.vector_store %arg12[%c3_49, %c0_50, %c0_51, %c0_52], %61 {strides = array<i32>} : memref<4x5x10x32xf32, #tpu.memory_space<vmem>>, vector<1x5x2x32xf32>,
    %62 = vector.extract_strided_slice %14 {offsets = [96, 0], sizes = [32, 32], strides = [1, 1]} : vector<128x32xf32> to vector<32x32xf32>
    %63 = vector.shape_cast %62 : vector<32x32xf32> to vector<4x8x32xf32>
    %c3_53 = arith.constant 3 : index
    %c1_54 = arith.constant 1 : index
    %c2_55 = arith.constant 2 : index
    %c0_56 = arith.constant 0 : index
    %64 = vector.load %arg12[%c3_53, %c1_54, %c2_55, %c0_56] : memref<4x5x10x32xf32, #tpu.memory_space<vmem>>, vector<1x4x8x32xf32>
    %65 = vector.shape_cast %64 : vector<1x4x8x32xf32> to vector<4x8x32xf32>
    %66 = vector.shape_cast %63 : vector<4x8x32xf32> to vector<1x4x8x32xf32>
    tpu.vector_store %arg12[%c3_53, %c1_54, %c2_55, %c0_56], %66 {strides = array<i32>} : memref<4x5x10x32xf32, #tpu.memory_space<vmem>>, vector<1x4x8x32xf32>,
    %c3_57 = arith.constant 3 : index
    %c0_58 = arith.constant 0 : index
    %c0_59 = arith.constant 0 : index
    %c0_60 = arith.constant 0 : index
    %67 = vector.load %arg12[%c3_57, %c0_58, %c0_59, %c0_60] : memref<4x5x10x32xf32, #tpu.memory_space<vmem>>, vector<1x4x8x32xf32>
    %68 = vector.shape_cast %67 : vector<1x4x8x32xf32> to vector<4x8x32xf32>
    %69 = vector.shape_cast %68 : vector<4x8x32xf32> to vector<32x32xf32>
    %70 = arith.truncf %69 : vector<32x32xf32> to vector<32x32xbf16>
    %c2_61 = arith.constant 2 : index
    %c0_62 = arith.constant 0 : index
    %c0_63 = arith.constant 0 : index
    %c0_64 = arith.constant 0 : index
    %71 = vector.load %arg12[%c2_61, %c0_62, %c0_63, %c0_64] : memref<4x5x10x32xf32, #tpu.memory_space<vmem>>, vector<1x4x8x32xf32>
    %72 = vector.shape_cast %71 : vector<1x4x8x32xf32> to vector<4x8x32xf32>
    %73 = vector.shape_cast %72 : vector<4x8x32xf32> to vector<32x32xf32>
    %74 = arith.truncf %73 : vector<32x32xf32> to vector<32x32xbf16>
    %c3_65 = arith.constant 3 : index
    %c0_66 = arith.constant 0 : index
    %c2_67 = arith.constant 2 : index
    %c0_68 = arith.constant 0 : index
    %75 = vector.load %arg12[%c3_65, %c0_66, %c2_67, %c0_68] : memref<4x5x10x32xf32, #tpu.memory_space<vmem>>, vector<1x4x8x32xf32>
    %76 = vector.shape_cast %75 : vector<1x4x8x32xf32> to vector<4x8x32xf32>
    %77 = vector.shape_cast %76 : vector<4x8x32xf32> to vector<32x32xf32>
    %78 = arith.truncf %77 : vector<32x32xf32> to vector<32x32xbf16>
    %c2_69 = arith.constant 2 : index
    %c0_70 = arith.constant 0 : index
    %c2_71 = arith.constant 2 : index
    %c0_72 = arith.constant 0 : index
    %79 = vector.load %arg12[%c2_69, %c0_70, %c2_71, %c0_72] : memref<4x5x10x32xf32, #tpu.memory_space<vmem>>, vector<1x4x8x32xf32>
    %80 = vector.shape_cast %79 : vector<1x4x8x32xf32> to vector<4x8x32xf32>
    %81 = vector.shape_cast %80 : vector<4x8x32xf32> to vector<32x32xf32>
    %82 = arith.truncf %81 : vector<32x32xf32> to vector<32x32xbf16>
    %c1_73 = arith.constant 1 : index
    %c0_74 = arith.constant 0 : index
    %c0_75 = arith.constant 0 : index
    %c0_76 = arith.constant 0 : index
    %83 = vector.load %arg12[%c1_73, %c0_74, %c0_75, %c0_76] : memref<4x5x10x32xf32, #tpu.memory_space<vmem>>, vector<1x4x8x32xf32>
    %84 = vector.shape_cast %83 : vector<1x4x8x32xf32> to vector<4x8x32xf32>
    %85 = vector.shape_cast %84 : vector<4x8x32xf32> to vector<32x32xf32>
    %86 = arith.truncf %85 : vector<32x32xf32> to vector<32x32xbf16>
    %c0_77 = arith.constant 0 : index
    %c0_78 = arith.constant 0 : index
    %c0_79 = arith.constant 0 : index
    %c0_80 = arith.constant 0 : index
    %87 = vector.load %arg12[%c0_77, %c0_78, %c0_79, %c0_80] : memref<4x5x10x32xf32, #tpu.memory_space<vmem>>, vector<1x4x8x32xf32>
    %88 = vector.shape_cast %87 : vector<1x4x8x32xf32> to vector<4x8x32xf32>
    %89 = vector.shape_cast %88 : vector<4x8x32xf32> to vector<32x32xf32>
    %90 = arith.truncf %89 : vector<32x32xf32> to vector<32x32xbf16>
    %c1_81 = arith.constant 1 : index
    %c0_82 = arith.constant 0 : index
    %c2_83 = arith.constant 2 : index
    %c0_84 = arith.constant 0 : index
    %91 = vector.load %arg12[%c1_81, %c0_82, %c2_83, %c0_84] : memref<4x5x10x32xf32, #tpu.memory_space<vmem>>, vector<1x4x8x32xf32>
    %92 = vector.shape_cast %91 : vector<1x4x8x32xf32> to vector<4x8x32xf32>
    %93 = vector.shape_cast %92 : vector<4x8x32xf32> to vector<32x32xf32>
    %94 = arith.truncf %93 : vector<32x32xf32> to vector<32x32xbf16>
    %c0_85 = arith.constant 0 : index
    %c0_86 = arith.constant 0 : index
    %c2_87 = arith.constant 2 : index
    %c0_88 = arith.constant 0 : index
    %95 = vector.load %arg12[%c0_85, %c0_86, %c2_87, %c0_88] : memref<4x5x10x32xf32, #tpu.memory_space<vmem>>, vector<1x4x8x32xf32>
    %96 = vector.shape_cast %95 : vector<1x4x8x32xf32> to vector<4x8x32xf32>
    %97 = vector.shape_cast %96 : vector<4x8x32xf32> to vector<32x32xf32>
    %98 = arith.truncf %97 : vector<32x32xf32> to vector<32x32xbf16>
    %c3_89 = arith.constant 3 : index
    %c1_90 = arith.constant 1 : index
    %c0_91 = arith.constant 0 : index
    %c0_92 = arith.constant 0 : index
    %99 = vector.load %arg12[%c3_89, %c1_90, %c0_91, %c0_92] : memref<4x5x10x32xf32, #tpu.memory_space<vmem>>, vector<1x4x8x32xf32>
    %100 = vector.shape_cast %99 : vector<1x4x8x32xf32> to vector<4x8x32xf32>
    %101 = vector.shape_cast %100 : vector<4x8x32xf32> to vector<32x32xf32>
    %102 = arith.truncf %101 : vector<32x32xf32> to vector<32x32xbf16>
    %c2_93 = arith.constant 2 : index
    %c1_94 = arith.constant 1 : index
    %c0_95 = arith.constant 0 : index
    %c0_96 = arith.constant 0 : index
    %103 = vector.load %arg12[%c2_93, %c1_94, %c0_95, %c0_96] : memref<4x5x10x32xf32, #tpu.memory_space<vmem>>, vector<1x4x8x32xf32>
    %104 = vector.shape_cast %103 : vector<1x4x8x32xf32> to vector<4x8x32xf32>
    %105 = vector.shape_cast %104 : vector<4x8x32xf32> to vector<32x32xf32>
    %106 = arith.truncf %105 : vector<32x32xf32> to vector<32x32xbf16>
    %c3_97 = arith.constant 3 : index
    %c1_98 = arith.constant 1 : index
    %c2_99 = arith.constant 2 : index
    %c0_100 = arith.constant 0 : index
    %107 = vector.load %arg12[%c3_97, %c1_98, %c2_99, %c0_100] : memref<4x5x10x32xf32, #tpu.memory_space<vmem>>, vector<1x4x8x32xf32>
    %108 = vector.shape_cast %107 : vector<1x4x8x32xf32> to vector<4x8x32xf32>
    %109 = vector.shape_cast %108 : vector<4x8x32xf32> to vector<32x32xf32>
    %110 = arith.truncf %109 : vector<32x32xf32> to vector<32x32xbf16>
    %c2_101 = arith.constant 2 : index
    %c1_102 = arith.constant 1 : index
    %c2_103 = arith.constant 2 : index
    %c0_104 = arith.constant 0 : index
    %111 = vector.load %arg12[%c2_101, %c1_102, %c2_103, %c0_104] : memref<4x5x10x32xf32, #tpu.memory_space<vmem>>, vector<1x4x8x32xf32>
    %112 = vector.shape_cast %111 : vector<1x4x8x32xf32> to vector<4x8x32xf32>
    %113 = vector.shape_cast %112 : vector<4x8x32xf32> to vector<32x32xf32>
    %114 = arith.truncf %113 : vector<32x32xf32> to vector<32x32xbf16>
    %c1_105 = arith.constant 1 : index
    %c1_106 = arith.constant 1 : index
    %c0_107 = arith.constant 0 : index
    %c0_108 = arith.constant 0 : index
    %115 = vector.load %arg12[%c1_105, %c1_106, %c0_107, %c0_108] : memref<4x5x10x32xf32, #tpu.memory_space<vmem>>, vector<1x4x8x32xf32>
    %116 = vector.shape_cast %115 : vector<1x4x8x32xf32> to vector<4x8x32xf32>
    %117 = vector.shape_cast %116 : vector<4x8x32xf32> to vector<32x32xf32>
    %118 = arith.truncf %117 : vector<32x32xf32> to vector<32x32xbf16>
    %c0_109 = arith.constant 0 : index
    %c1_110 = arith.constant 1 : index
    %c0_111 = arith.constant 0 : index
    %c0_112 = arith.constant 0 : index
    %119 = vector.load %arg12[%c0_109, %c1_110, %c0_111, %c0_112] : memref<4x5x10x32xf32, #tpu.memory_space<vmem>>, vector<1x4x8x32xf32>
    %120 = vector.shape_cast %119 : vector<1x4x8x32xf32> to vector<4x8x32xf32>
    %121 = vector.shape_cast %120 : vector<4x8x32xf32> to vector<32x32xf32>
    %122 = arith.truncf %121 : vector<32x32xf32> to vector<32x32xbf16>
    %c1_113 = arith.constant 1 : index
    %c1_114 = arith.constant 1 : index
    %c2_115 = arith.constant 2 : index
    %c0_116 = arith.constant 0 : index
    %123 = vector.load %arg12[%c1_113, %c1_114, %c2_115, %c0_116] : memref<4x5x10x32xf32, #tpu.memory_space<vmem>>, vector<1x4x8x32xf32>
    %124 = vector.shape_cast %123 : vector<1x4x8x32xf32> to vector<4x8x32xf32>
    %125 = vector.shape_cast %124 : vector<4x8x32xf32> to vector<32x32xf32>
    %126 = arith.truncf %125 : vector<32x32xf32> to vector<32x32xbf16>
    %c0_117 = arith.constant 0 : index
    %c1_118 = arith.constant 1 : index
    %c2_119 = arith.constant 2 : index
    %c0_120 = arith.constant 0 : index
    %127 = vector.load %arg12[%c0_117, %c1_118, %c2_119, %c0_120] : memref<4x5x10x32xf32, #tpu.memory_space<vmem>>, vector<1x4x8x32xf32>
    %128 = vector.shape_cast %127 : vector<1x4x8x32xf32> to vector<4x8x32xf32>
    %129 = vector.shape_cast %128 : vector<4x8x32xf32> to vector<32x32xf32>
    %130 = arith.truncf %129 : vector<32x32xf32> to vector<32x32xbf16>
    %cst_121 = arith.constant 0.000000e+00 : f32
    %131 = vector.broadcast %cst_121 : f32 to vector<128x64xf32>
    %132 = tpu.concatenate %70, %74, %86, %90 in 0 : vector<32x32xbf16>, vector<32x32xbf16>, vector<32x32xbf16>, vector<32x32xbf16> -> vector<128x32xbf16>
    %c0_122 = arith.constant 0 : index
    %c0_123 = arith.constant 0 : index
    %133 = vector.load %arg3[%c0_122, %c0_123] : memref<288x64xbf16, #tpu.memory_space<vmem>>, vector<32x64xbf16>
    %cst_124 = arith.constant dense<0.000000e+00> : vector<128x64xf32>
    %134 = tpu.matmul %132, %133, %cst_124 {dimension_numbers = #tpu.dot_dimension_numbers<[1], [0], [0], [1], [0, 0, 1, 1], [], []>} : vector<128x32xbf16>, vector<32x64xbf16>, vector<128x64xf32> -> vector<128x64xf32>
    %135 = arith.addf %131, %134 : vector<128x64xf32>
    %136 = tpu.concatenate %74, %78, %90, %94 in 0 : vector<32x32xbf16>, vector<32x32xbf16>, vector<32x32xbf16>, vector<32x32xbf16> -> vector<128x32xbf16>
    %c32 = arith.constant 32 : index
    %c0_125 = arith.constant 0 : index
    %137 = vector.load %arg3[%c32, %c0_125] : memref<288x64xbf16, #tpu.memory_space<vmem>>, vector<32x64xbf16>
    %cst_126 = arith.constant dense<0.000000e+00> : vector<128x64xf32>
    %138 = tpu.matmul %136, %137, %cst_126 {dimension_numbers = #tpu.dot_dimension_numbers<[1], [0], [0], [1], [0, 0, 1, 1], [], []>} : vector<128x32xbf16>, vector<32x64xbf16>, vector<128x64xf32> -> vector<128x64xf32>
    %139 = arith.addf %135, %138 : vector<128x64xf32>
    %140 = tpu.concatenate %78, %82, %94, %98 in 0 : vector<32x32xbf16>, vector<32x32xbf16>, vector<32x32xbf16>, vector<32x32xbf16> -> vector<128x32xbf16>
    %c64 = arith.constant 64 : index
    %c0_127 = arith.constant 0 : index
    %141 = vector.load %arg3[%c64, %c0_127] : memref<288x64xbf16, #tpu.memory_space<vmem>>, vector<32x64xbf16>
    %cst_128 = arith.constant dense<0.000000e+00> : vector<128x64xf32>
    %142 = tpu.matmul %140, %141, %cst_128 {dimension_numbers = #tpu.dot_dimension_numbers<[1], [0], [0], [1], [0, 0, 1, 1], [], []>} : vector<128x32xbf16>, vector<32x64xbf16>, vector<128x64xf32> -> vector<128x64xf32>
    %143 = arith.addf %139, %142 : vector<128x64xf32>
    %144 = tpu.concatenate %86, %90, %102, %106 in 0 : vector<32x32xbf16>, vector<32x32xbf16>, vector<32x32xbf16>, vector<32x32xbf16> -> vector<128x32xbf16>
    %c96 = arith.constant 96 : index
    %c0_129 = arith.constant 0 : index
    %145 = vector.load %arg3[%c96, %c0_129] : memref<288x64xbf16, #tpu.memory_space<vmem>>, vector<32x64xbf16>
    %cst_130 = arith.constant dense<0.000000e+00> : vector<128x64xf32>
    %146 = tpu.matmul %144, %145, %cst_130 {dimension_numbers = #tpu.dot_dimension_numbers<[1], [0], [0], [1], [0, 0, 1, 1], [], []>} : vector<128x32xbf16>, vector<32x64xbf16>, vector<128x64xf32> -> vector<128x64xf32>
    %147 = arith.addf %143, %146 : vector<128x64xf32>
    %148 = tpu.concatenate %90, %94, %106, %110 in 0 : vector<32x32xbf16>, vector<32x32xbf16>, vector<32x32xbf16>, vector<32x32xbf16> -> vector<128x32xbf16>
    %c128 = arith.constant 128 : index
    %c0_131 = arith.constant 0 : index
    %149 = vector.load %arg3[%c128, %c0_131] : memref<288x64xbf16, #tpu.memory_space<vmem>>, vector<32x64xbf16>
    %cst_132 = arith.constant dense<0.000000e+00> : vector<128x64xf32>
    %150 = tpu.matmul %148, %149, %cst_132 {dimension_numbers = #tpu.dot_dimension_numbers<[1], [0], [0], [1], [0, 0, 1, 1], [], []>} : vector<128x32xbf16>, vector<32x64xbf16>, vector<128x64xf32> -> vector<128x64xf32>
    %151 = arith.addf %147, %150 : vector<128x64xf32>
    %152 = tpu.concatenate %94, %98, %110, %114 in 0 : vector<32x32xbf16>, vector<32x32xbf16>, vector<32x32xbf16>, vector<32x32xbf16> -> vector<128x32xbf16>
    %c160 = arith.constant 160 : index
    %c0_133 = arith.constant 0 : index
    %153 = vector.load %arg3[%c160, %c0_133] : memref<288x64xbf16, #tpu.memory_space<vmem>>, vector<32x64xbf16>
    %cst_134 = arith.constant dense<0.000000e+00> : vector<128x64xf32>
    %154 = tpu.matmul %152, %153, %cst_134 {dimension_numbers = #tpu.dot_dimension_numbers<[1], [0], [0], [1], [0, 0, 1, 1], [], []>} : vector<128x32xbf16>, vector<32x64xbf16>, vector<128x64xf32> -> vector<128x64xf32>
    %155 = arith.addf %151, %154 : vector<128x64xf32>
    %156 = tpu.concatenate %102, %106, %118, %122 in 0 : vector<32x32xbf16>, vector<32x32xbf16>, vector<32x32xbf16>, vector<32x32xbf16> -> vector<128x32xbf16>
    %c192 = arith.constant 192 : index
    %c0_135 = arith.constant 0 : index
    %157 = vector.load %arg3[%c192, %c0_135] : memref<288x64xbf16, #tpu.memory_space<vmem>>, vector<32x64xbf16>
    %cst_136 = arith.constant dense<0.000000e+00> : vector<128x64xf32>
    %158 = tpu.matmul %156, %157, %cst_136 {dimension_numbers = #tpu.dot_dimension_numbers<[1], [0], [0], [1], [0, 0, 1, 1], [], []>} : vector<128x32xbf16>, vector<32x64xbf16>, vector<128x64xf32> -> vector<128x64xf32>
    %159 = arith.addf %155, %158 : vector<128x64xf32>
    %160 = tpu.concatenate %106, %110, %122, %126 in 0 : vector<32x32xbf16>, vector<32x32xbf16>, vector<32x32xbf16>, vector<32x32xbf16> -> vector<128x32xbf16>
    %c224 = arith.constant 224 : index
    %c0_137 = arith.constant 0 : index
    %161 = vector.load %arg3[%c224, %c0_137] : memref<288x64xbf16, #tpu.memory_space<vmem>>, vector<32x64xbf16>
    %cst_138 = arith.constant dense<0.000000e+00> : vector<128x64xf32>
    %162 = tpu.matmul %160, %161, %cst_138 {dimension_numbers = #tpu.dot_dimension_numbers<[1], [0], [0], [1], [0, 0, 1, 1], [], []>} : vector<128x32xbf16>, vector<32x64xbf16>, vector<128x64xf32> -> vector<128x64xf32>
    %163 = arith.addf %159, %162 : vector<128x64xf32>
    %164 = tpu.concatenate %110, %114, %126, %130 in 0 : vector<32x32xbf16>, vector<32x32xbf16>, vector<32x32xbf16>, vector<32x32xbf16> -> vector<128x32xbf16>
    %c256 = arith.constant 256 : index
    %c0_139 = arith.constant 0 : index
    %165 = vector.load %arg3[%c256, %c0_139] : memref<288x64xbf16, #tpu.memory_space<vmem>>, vector<32x64xbf16>
    %cst_140 = arith.constant dense<0.000000e+00> : vector<128x64xf32>
    %166 = tpu.matmul %164, %165, %cst_140 {dimension_numbers = #tpu.dot_dimension_numbers<[1], [0], [0], [1], [0, 0, 1, 1], [], []>} : vector<128x32xbf16>, vector<32x64xbf16>, vector<128x64xf32> -> vector<128x64xf32>
    %167 = arith.addf %163, %166 : vector<128x64xf32>
    %168 = vector.extract_strided_slice %167 {offsets = [0, 0], sizes = [32, 64], strides = [1, 1]} : vector<128x64xf32> to vector<32x64xf32>
    %169 = vector.extract_strided_slice %167 {offsets = [32, 0], sizes = [32, 64], strides = [1, 1]} : vector<128x64xf32> to vector<32x64xf32>
    %170 = arith.maximumf %168, %169 : vector<32x64xf32>
    %171 = vector.extract_strided_slice %167 {offsets = [64, 0], sizes = [32, 64], strides = [1, 1]} : vector<128x64xf32> to vector<32x64xf32>
    %172 = vector.extract_strided_slice %167 {offsets = [96, 0], sizes = [32, 64], strides = [1, 1]} : vector<128x64xf32> to vector<32x64xf32>
    %173 = arith.maximumf %171, %172 : vector<32x64xf32>
    %174 = arith.maximumf %170, %173 : vector<32x64xf32>
    %c0_141 = arith.constant 0 : index
    %c0_142 = arith.constant 0 : index
    %175 = vector.load %arg4[%c0_141, %c0_142] : memref<1x64xf32, #tpu.memory_space<vmem>>, vector<1x64xf32>
    %176 = vector.broadcast %175 : vector<1x64xf32> to vector<32x64xf32>
    %177 = arith.addf %174, %176 : vector<32x64xf32>
    %cst_143 = arith.constant 0.000000e+00 : f32
    %178 = vector.broadcast %cst_143 : f32 to vector<32x64xf32>
    %179 = arith.maximumf %177, %178 : vector<32x64xf32>
    tpu.wait_dma2 semaphore(%arg14 : memref<!tpu.dma_semaphore, #tpu.memory_space<semaphore_mem>>) src(%arg5 : memref<1024x128xbf16, #tpu.memory_space<any>>) dst(%arg13 : memref<1024x128xbf16, #tpu.memory_space<vmem>>)
    %180 = vector.shape_cast %179 : vector<32x64xf32> to vector<16x2x64xf32>
    %cst_144 = arith.constant 0.000000e+00 : f32
    %181 = vector.broadcast %cst_144 : f32 to vector<2x128xf32>
    %182 = vector.extract_strided_slice %180 {offsets = [0, 0, 0], sizes = [1, 2, 64], strides = [1, 1, 1]} : vector<16x2x64xf32> to vector<1x2x64xf32>
    %183 = vector.shape_cast %182 : vector<1x2x64xf32> to vector<2x64xf32>
    %184 = arith.truncf %183 : vector<2x64xf32> to vector<2x64xbf16>
    %c0_145 = arith.constant 0 : index
    %c0_146 = arith.constant 0 : index
    %185 = vector.load %arg13[%c0_145, %c0_146] : memref<1024x128xbf16, #tpu.memory_space<vmem>>, vector<64x128xbf16>
    %cst_147 = arith.constant dense<0.000000e+00> : vector<2x128xf32>
    %186 = tpu.matmul %184, %185, %cst_147 {dimension_numbers = #tpu.dot_dimension_numbers<[1], [0], [0], [1], [0, 0, 1, 1], [], []>} : vector<2x64xbf16>, vector<64x128xbf16>, vector<2x128xf32> -> vector<2x128xf32>
    %187 = arith.addf %181, %186 : vector<2x128xf32>
    %188 = vector.extract_strided_slice %180 {offsets = [1, 0, 0], sizes = [1, 2, 64], strides = [1, 1, 1]} : vector<16x2x64xf32> to vector<1x2x64xf32>
    %189 = vector.shape_cast %188 : vector<1x2x64xf32> to vector<2x64xf32>
    %190 = arith.truncf %189 : vector<2x64xf32> to vector<2x64xbf16>
    %c64_148 = arith.constant 64 : index
    %c0_149 = arith.constant 0 : index
    %191 = vector.load %arg13[%c64_148, %c0_149] : memref<1024x128xbf16, #tpu.memory_space<vmem>>, vector<64x128xbf16>
    %cst_150 = arith.constant dense<0.000000e+00> : vector<2x128xf32>
    %192 = tpu.matmul %190, %191, %cst_150 {dimension_numbers = #tpu.dot_dimension_numbers<[1], [0], [0], [1], [0, 0, 1, 1], [], []>} : vector<2x64xbf16>, vector<64x128xbf16>, vector<2x128xf32> -> vector<2x128xf32>
    %193 = arith.addf %187, %192 : vector<2x128xf32>
    %194 = vector.extract_strided_slice %180 {offsets = [2, 0, 0], sizes = [1, 2, 64], strides = [1, 1, 1]} : vector<16x2x64xf32> to vector<1x2x64xf32>
    %195 = vector.shape_cast %194 : vector<1x2x64xf32> to vector<2x64xf32>
    %196 = arith.truncf %195 : vector<2x64xf32> to vector<2x64xbf16>
    %c128_151 = arith.constant 128 : index
    %c0_152 = arith.constant 0 : index
    %197 = vector.load %arg13[%c128_151, %c0_152] : memref<1024x128xbf16, #tpu.memory_space<vmem>>, vector<64x128xbf16>
    %cst_153 = arith.constant dense<0.000000e+00> : vector<2x128xf32>
    %198 = tpu.matmul %196, %197, %cst_153 {dimension_numbers = #tpu.dot_dimension_numbers<[1], [0], [0], [1], [0, 0, 1, 1], [], []>} : vector<2x64xbf16>, vector<64x128xbf16>, vector<2x128xf32> -> vector<2x128xf32>
    %199 = arith.addf %193, %198 : vector<2x128xf32>
    %200 = vector.extract_strided_slice %180 {offsets = [3, 0, 0], sizes = [1, 2, 64], strides = [1, 1, 1]} : vector<16x2x64xf32> to vector<1x2x64xf32>
    %201 = vector.shape_cast %200 : vector<1x2x64xf32> to vector<2x64xf32>
    %202 = arith.truncf %201 : vector<2x64xf32> to vector<2x64xbf16>
    %c192_154 = arith.constant 192 : index
    %c0_155 = arith.constant 0 : index
    %203 = vector.load %arg13[%c192_154, %c0_155] : memref<1024x128xbf16, #tpu.memory_space<vmem>>, vector<64x128xbf16>
    %cst_156 = arith.constant dense<0.000000e+00> : vector<2x128xf32>
    %204 = tpu.matmul %202, %203, %cst_156 {dimension_numbers = #tpu.dot_dimension_numbers<[1], [0], [0], [1], [0, 0, 1, 1], [], []>} : vector<2x64xbf16>, vector<64x128xbf16>, vector<2x128xf32> -> vector<2x128xf32>
    %205 = arith.addf %199, %204 : vector<2x128xf32>
    %206 = vector.extract_strided_slice %180 {offsets = [4, 0, 0], sizes = [1, 2, 64], strides = [1, 1, 1]} : vector<16x2x64xf32> to vector<1x2x64xf32>
    %207 = vector.shape_cast %206 : vector<1x2x64xf32> to vector<2x64xf32>
    %208 = arith.truncf %207 : vector<2x64xf32> to vector<2x64xbf16>
    %c256_157 = arith.constant 256 : index
    %c0_158 = arith.constant 0 : index
    %209 = vector.load %arg13[%c256_157, %c0_158] : memref<1024x128xbf16, #tpu.memory_space<vmem>>, vector<64x128xbf16>
    %cst_159 = arith.constant dense<0.000000e+00> : vector<2x128xf32>
    %210 = tpu.matmul %208, %209, %cst_159 {dimension_numbers = #tpu.dot_dimension_numbers<[1], [0], [0], [1], [0, 0, 1, 1], [], []>} : vector<2x64xbf16>, vector<64x128xbf16>, vector<2x128xf32> -> vector<2x128xf32>
    %211 = arith.addf %205, %210 : vector<2x128xf32>
    %212 = vector.extract_strided_slice %180 {offsets = [5, 0, 0], sizes = [1, 2, 64], strides = [1, 1, 1]} : vector<16x2x64xf32> to vector<1x2x64xf32>
    %213 = vector.shape_cast %212 : vector<1x2x64xf32> to vector<2x64xf32>
    %214 = arith.truncf %213 : vector<2x64xf32> to vector<2x64xbf16>
    %c320 = arith.constant 320 : index
    %c0_160 = arith.constant 0 : index
    %215 = vector.load %arg13[%c320, %c0_160] : memref<1024x128xbf16, #tpu.memory_space<vmem>>, vector<64x128xbf16>
    %cst_161 = arith.constant dense<0.000000e+00> : vector<2x128xf32>
    %216 = tpu.matmul %214, %215, %cst_161 {dimension_numbers = #tpu.dot_dimension_numbers<[1], [0], [0], [1], [0, 0, 1, 1], [], []>} : vector<2x64xbf16>, vector<64x128xbf16>, vector<2x128xf32> -> vector<2x128xf32>
    %217 = arith.addf %211, %216 : vector<2x128xf32>
    %218 = vector.extract_strided_slice %180 {offsets = [6, 0, 0], sizes = [1, 2, 64], strides = [1, 1, 1]} : vector<16x2x64xf32> to vector<1x2x64xf32>
    %219 = vector.shape_cast %218 : vector<1x2x64xf32> to vector<2x64xf32>
    %220 = arith.truncf %219 : vector<2x64xf32> to vector<2x64xbf16>
    %c384 = arith.constant 384 : index
    %c0_162 = arith.constant 0 : index
    %221 = vector.load %arg13[%c384, %c0_162] : memref<1024x128xbf16, #tpu.memory_space<vmem>>, vector<64x128xbf16>
    %cst_163 = arith.constant dense<0.000000e+00> : vector<2x128xf32>
    %222 = tpu.matmul %220, %221, %cst_163 {dimension_numbers = #tpu.dot_dimension_numbers<[1], [0], [0], [1], [0, 0, 1, 1], [], []>} : vector<2x64xbf16>, vector<64x128xbf16>, vector<2x128xf32> -> vector<2x128xf32>
    %223 = arith.addf %217, %222 : vector<2x128xf32>
    %224 = vector.extract_strided_slice %180 {offsets = [7, 0, 0], sizes = [1, 2, 64], strides = [1, 1, 1]} : vector<16x2x64xf32> to vector<1x2x64xf32>
    %225 = vector.shape_cast %224 : vector<1x2x64xf32> to vector<2x64xf32>
    %226 = arith.truncf %225 : vector<2x64xf32> to vector<2x64xbf16>
    %c448 = arith.constant 448 : index
    %c0_164 = arith.constant 0 : index
    %227 = vector.load %arg13[%c448, %c0_164] : memref<1024x128xbf16, #tpu.memory_space<vmem>>, vector<64x128xbf16>
    %cst_165 = arith.constant dense<0.000000e+00> : vector<2x128xf32>
    %228 = tpu.matmul %226, %227, %cst_165 {dimension_numbers = #tpu.dot_dimension_numbers<[1], [0], [0], [1], [0, 0, 1, 1], [], []>} : vector<2x64xbf16>, vector<64x128xbf16>, vector<2x128xf32> -> vector<2x128xf32>
    %229 = arith.addf %223, %228 : vector<2x128xf32>
    %230 = vector.extract_strided_slice %180 {offsets = [8, 0, 0], sizes = [1, 2, 64], strides = [1, 1, 1]} : vector<16x2x64xf32> to vector<1x2x64xf32>
    %231 = vector.shape_cast %230 : vector<1x2x64xf32> to vector<2x64xf32>
    %232 = arith.truncf %231 : vector<2x64xf32> to vector<2x64xbf16>
    %c512 = arith.constant 512 : index
    %c0_166 = arith.constant 0 : index
    %233 = vector.load %arg13[%c512, %c0_166] : memref<1024x128xbf16, #tpu.memory_space<vmem>>, vector<64x128xbf16>
    %cst_167 = arith.constant dense<0.000000e+00> : vector<2x128xf32>
    %234 = tpu.matmul %232, %233, %cst_167 {dimension_numbers = #tpu.dot_dimension_numbers<[1], [0], [0], [1], [0, 0, 1, 1], [], []>} : vector<2x64xbf16>, vector<64x128xbf16>, vector<2x128xf32> -> vector<2x128xf32>
    %235 = arith.addf %229, %234 : vector<2x128xf32>
    %236 = vector.extract_strided_slice %180 {offsets = [9, 0, 0], sizes = [1, 2, 64], strides = [1, 1, 1]} : vector<16x2x64xf32> to vector<1x2x64xf32>
    %237 = vector.shape_cast %236 : vector<1x2x64xf32> to vector<2x64xf32>
    %238 = arith.truncf %237 : vector<2x64xf32> to vector<2x64xbf16>
    %c576 = arith.constant 576 : index
    %c0_168 = arith.constant 0 : index
    %239 = vector.load %arg13[%c576, %c0_168] : memref<1024x128xbf16, #tpu.memory_space<vmem>>, vector<64x128xbf16>
    %cst_169 = arith.constant dense<0.000000e+00> : vector<2x128xf32>
    %240 = tpu.matmul %238, %239, %cst_169 {dimension_numbers = #tpu.dot_dimension_numbers<[1], [0], [0], [1], [0, 0, 1, 1], [], []>} : vector<2x64xbf16>, vector<64x128xbf16>, vector<2x128xf32> -> vector<2x128xf32>
    %241 = arith.addf %235, %240 : vector<2x128xf32>
    %242 = vector.extract_strided_slice %180 {offsets = [10, 0, 0], sizes = [1, 2, 64], strides = [1, 1, 1]} : vector<16x2x64xf32> to vector<1x2x64xf32>
    %243 = vector.shape_cast %242 : vector<1x2x64xf32> to vector<2x64xf32>
    %244 = arith.truncf %243 : vector<2x64xf32> to vector<2x64xbf16>
    %c640 = arith.constant 640 : index
    %c0_170 = arith.constant 0 : index
    %245 = vector.load %arg13[%c640, %c0_170] : memref<1024x128xbf16, #tpu.memory_space<vmem>>, vector<64x128xbf16>
    %cst_171 = arith.constant dense<0.000000e+00> : vector<2x128xf32>
    %246 = tpu.matmul %244, %245, %cst_171 {dimension_numbers = #tpu.dot_dimension_numbers<[1], [0], [0], [1], [0, 0, 1, 1], [], []>} : vector<2x64xbf16>, vector<64x128xbf16>, vector<2x128xf32> -> vector<2x128xf32>
    %247 = arith.addf %241, %246 : vector<2x128xf32>
    %248 = vector.extract_strided_slice %180 {offsets = [11, 0, 0], sizes = [1, 2, 64], strides = [1, 1, 1]} : vector<16x2x64xf32> to vector<1x2x64xf32>
    %249 = vector.shape_cast %248 : vector<1x2x64xf32> to vector<2x64xf32>
    %250 = arith.truncf %249 : vector<2x64xf32> to vector<2x64xbf16>
    %c704 = arith.constant 704 : index
    %c0_172 = arith.constant 0 : index
    %251 = vector.load %arg13[%c704, %c0_172] : memref<1024x128xbf16, #tpu.memory_space<vmem>>, vector<64x128xbf16>
    %cst_173 = arith.constant dense<0.000000e+00> : vector<2x128xf32>
    %252 = tpu.matmul %250, %251, %cst_173 {dimension_numbers = #tpu.dot_dimension_numbers<[1], [0], [0], [1], [0, 0, 1, 1], [], []>} : vector<2x64xbf16>, vector<64x128xbf16>, vector<2x128xf32> -> vector<2x128xf32>
    %253 = arith.addf %247, %252 : vector<2x128xf32>
    %254 = vector.extract_strided_slice %180 {offsets = [12, 0, 0], sizes = [1, 2, 64], strides = [1, 1, 1]} : vector<16x2x64xf32> to vector<1x2x64xf32>
    %255 = vector.shape_cast %254 : vector<1x2x64xf32> to vector<2x64xf32>
    %256 = arith.truncf %255 : vector<2x64xf32> to vector<2x64xbf16>
    %c768 = arith.constant 768 : index
    %c0_174 = arith.constant 0 : index
    %257 = vector.load %arg13[%c768, %c0_174] : memref<1024x128xbf16, #tpu.memory_space<vmem>>, vector<64x128xbf16>
    %cst_175 = arith.constant dense<0.000000e+00> : vector<2x128xf32>
    %258 = tpu.matmul %256, %257, %cst_175 {dimension_numbers = #tpu.dot_dimension_numbers<[1], [0], [0], [1], [0, 0, 1, 1], [], []>} : vector<2x64xbf16>, vector<64x128xbf16>, vector<2x128xf32> -> vector<2x128xf32>
    %259 = arith.addf %253, %258 : vector<2x128xf32>
    %260 = vector.extract_strided_slice %180 {offsets = [13, 0, 0], sizes = [1, 2, 64], strides = [1, 1, 1]} : vector<16x2x64xf32> to vector<1x2x64xf32>
    %261 = vector.shape_cast %260 : vector<1x2x64xf32> to vector<2x64xf32>
    %262 = arith.truncf %261 : vector<2x64xf32> to vector<2x64xbf16>
    %c832 = arith.constant 832 : index
    %c0_176 = arith.constant 0 : index
    %263 = vector.load %arg13[%c832, %c0_176] : memref<1024x128xbf16, #tpu.memory_space<vmem>>, vector<64x128xbf16>
    %cst_177 = arith.constant dense<0.000000e+00> : vector<2x128xf32>
    %264 = tpu.matmul %262, %263, %cst_177 {dimension_numbers = #tpu.dot_dimension_numbers<[1], [0], [0], [1], [0, 0, 1, 1], [], []>} : vector<2x64xbf16>, vector<64x128xbf16>, vector<2x128xf32> -> vector<2x128xf32>
    %265 = arith.addf %259, %264 : vector<2x128xf32>
    %266 = vector.extract_strided_slice %180 {offsets = [14, 0, 0], sizes = [1, 2, 64], strides = [1, 1, 1]} : vector<16x2x64xf32> to vector<1x2x64xf32>
    %267 = vector.shape_cast %266 : vector<1x2x64xf32> to vector<2x64xf32>
    %268 = arith.truncf %267 : vector<2x64xf32> to vector<2x64xbf16>
    %c896 = arith.constant 896 : index
    %c0_178 = arith.constant 0 : index
    %269 = vector.load %arg13[%c896, %c0_178] : memref<1024x128xbf16, #tpu.memory_space<vmem>>, vector<64x128xbf16>
    %cst_179 = arith.constant dense<0.000000e+00> : vector<2x128xf32>
    %270 = tpu.matmul %268, %269, %cst_179 {dimension_numbers = #tpu.dot_dimension_numbers<[1], [0], [0], [1], [0, 0, 1, 1], [], []>} : vector<2x64xbf16>, vector<64x128xbf16>, vector<2x128xf32> -> vector<2x128xf32>
    %271 = arith.addf %265, %270 : vector<2x128xf32>
    %272 = vector.extract_strided_slice %180 {offsets = [15, 0, 0], sizes = [1, 2, 64], strides = [1, 1, 1]} : vector<16x2x64xf32> to vector<1x2x64xf32>
    %273 = vector.shape_cast %272 : vector<1x2x64xf32> to vector<2x64xf32>
    %274 = arith.truncf %273 : vector<2x64xf32> to vector<2x64xbf16>
    %c960 = arith.constant 960 : index
    %c0_180 = arith.constant 0 : index
    %275 = vector.load %arg13[%c960, %c0_180] : memref<1024x128xbf16, #tpu.memory_space<vmem>>, vector<64x128xbf16>
    %cst_181 = arith.constant dense<0.000000e+00> : vector<2x128xf32>
    %276 = tpu.matmul %274, %275, %cst_181 {dimension_numbers = #tpu.dot_dimension_numbers<[1], [0], [0], [1], [0, 0, 1, 1], [], []>} : vector<2x64xbf16>, vector<64x128xbf16>, vector<2x128xf32> -> vector<2x128xf32>
    %277 = arith.addf %271, %276 : vector<2x128xf32>
    %c0_182 = arith.constant 0 : index
    %c0_183 = arith.constant 0 : index
    %278 = vector.load %arg6[%c0_182, %c0_183] : memref<1x128xf32, #tpu.memory_space<vmem>>, vector<1x128xf32>
    %279 = vector.broadcast %278 : vector<1x128xf32> to vector<2x128xf32>
    %280 = arith.addf %277, %279 : vector<2x128xf32>
    %cst_184 = arith.constant 0.000000e+00 : f32
    %281 = vector.broadcast %cst_184 : f32 to vector<2x128xf32>
    %282 = arith.maximumf %280, %281 : vector<2x128xf32>
    %283 = arith.truncf %282 : vector<2x128xf32> to vector<2x128xbf16>
    %c0_185 = arith.constant 0 : index
    %c0_186 = arith.constant 0 : index
    %284 = vector.load %arg7[%c0_185, %c0_186] : memref<128x128xbf16, #tpu.memory_space<vmem>>, vector<128x128xbf16>
    %cst_187 = arith.constant dense<0.000000e+00> : vector<2x128xf32>
    %285 = tpu.matmul %283, %284, %cst_187 {dimension_numbers = #tpu.dot_dimension_numbers<[1], [0], [0], [1], [0, 0, 1, 1], [], []>} : vector<2x128xbf16>, vector<128x128xbf16>, vector<2x128xf32> -> vector<2x128xf32>
    %c0_188 = arith.constant 0 : index
    %c0_189 = arith.constant 0 : index
    %286 = vector.load %arg8[%c0_188, %c0_189] : memref<1x128xf32, #tpu.memory_space<vmem>>, vector<1x128xf32>
    %287 = vector.broadcast %286 : vector<1x128xf32> to vector<2x128xf32>
    %288 = arith.addf %285, %287 : vector<2x128xf32>
    %cst_190 = arith.constant 0.000000e+00 : f32
    %289 = vector.broadcast %cst_190 : f32 to vector<2x128xf32>
    %290 = arith.maximumf %288, %289 : vector<2x128xf32>
    %291 = arith.truncf %290 : vector<2x128xf32> to vector<2x128xbf16>
    %c0_191 = arith.constant 0 : index
    %c0_192 = arith.constant 0 : index
    %292 = vector.load %arg9[%c0_191, %c0_192] : memref<128x8xbf16, #tpu.memory_space<vmem>>, vector<128x8xbf16>
    %cst_193 = arith.constant dense<0.000000e+00> : vector<2x8xf32>
    %293 = tpu.matmul %291, %292, %cst_193 {dimension_numbers = #tpu.dot_dimension_numbers<[1], [0], [0], [1], [0, 0, 1, 1], [], []>} : vector<2x128xbf16>, vector<128x8xbf16>, vector<2x8xf32> -> vector<2x8xf32>
    %c0_194 = arith.constant 0 : index
    %c0_195 = arith.constant 0 : index
    %294 = vector.load %arg10[%c0_194, %c0_195] : memref<1x8xf32, #tpu.memory_space<vmem>>, vector<1x8xf32>
    %295 = vector.broadcast %294 : vector<1x8xf32> to vector<2x8xf32>
    %296 = arith.addf %293, %295 : vector<2x8xf32>
    %c0_196 = arith.constant 0 : index
    %c0_197 = arith.constant 0 : index
    %297 = vector.load %arg11[%c0_196, %c0_197] : memref<2x8xf32, #tpu.memory_space<vmem>>, vector<2x8xf32>
    tpu.vector_store %arg11[%c0_196, %c0_197], %296 {strides = array<i32>} : memref<2x8xf32, #tpu.memory_space<vmem>>, vector<2x8xf32>,
    return
  }
}

</mosaic_0001>

<bundles_post_ra>
// kernel: convnet_forward.1
= control target key start
LH: loop header
LB: loop body
LE: loop exit
PB: predicated region body
PF: predicated region fallthrough
CT: control target
= control target key end

     0   :  { %16 = vsyncpa [#allocation6], 0  ;;  %s4884_s0 = inlined_call_operand.vmem [shape: bf16[512,27], index: 0, kind: input, shape index: {}]   ;;  %s4885_s1 = inlined_call_operand.vmem [shape: bf16[27,32], index: 1, kind: input, shape index: {}]   ;;  %s4886_s2 = inlined_call_operand.vmem [shape: f32[1,32], index: 2, kind: input, shape index: {}]   ;;  %s4887_s3 = inlined_call_operand.vmem [shape: bf16[288,64], index: 3, kind: input, shape index: {}]   ;;  %s4888_s4 = inlined_call_operand.vmem [shape: f32[1,64], index: 4, kind: input, shape index: {}]   ;;  %s4889_s5 = inlined_call_operand.vmem [shape: bf16[1024,128], index: 5, kind: input, shape index: {}]   ;;  %s4890_s6 = inlined_call_operand.vmem [shape: f32[1,128], index: 6, kind: input, shape index: {}]   ;;  %s4891_s7 = inlined_call_operand.vmem [shape: bf16[128,128], index: 7, kind: input, shape index: {}]   ;;  %s4892_s8 = inlined_call_operand.vmem [shape: f32[1,128], index: 8, kind: input, shape index: {}]   ;;  %s4893_s9 = inlined_call_operand.vmem [shape: bf16[128,8], index: 9, kind: input, shape index: {}]   ;;  %s4894_s10 = inlined_call_operand.vmem [shape: f32[1,8], index: 10, kind: input, shape index: {}]   ;;  %s4895_s11 = inlined_call_operand.hbm [shape: f32[2,8], index: 11, kind: output, shape index: {}]  }
   0x1   :  { %v48_v0 = vld [vmem:[%s4889_s5] sm:$0xff]  ;;  %v50_v1 = vld [vmem:[%s4889_s5 + $0x8] sm:$0xff]  ;;  %v52_v2 = vld [vmem:[%s4889_s5 + $0x10] sm:$0xff] }
   0x2   :  { %49 = vst [vmem:[#allocation3 + $0xb0] sm:$0xff] %v48_v0  ;;  %v54_v3 = vld [vmem:[%s4889_s5 + $0x18] sm:$0xff]  ;;  %v56_v4 = vld [vmem:[%s4889_s5 + $0x20] sm:$0xff]  ;;  %v58_v5 = vld [vmem:[%s4889_s5 + $0x28] sm:$0xff] }
   0x3   :  { %51 = vst [vmem:[#allocation3 + $0x1b0] sm:$0xff] %v50_v1  ;;  %v60_v6 = vld [vmem:[%s4889_s5 + $0x30] sm:$0xff]  ;;  %v62_v7 = vld [vmem:[%s4889_s5 + $0x38] sm:$0xff]  ;;  %v64_v8 = vld [vmem:[%s4889_s5 + $0x40] sm:$0xff] }
   0x4   :  { %53 = vst [vmem:[#allocation3 + $0xd8] sm:$0xff] %v52_v2  ;;  %v66_v9 = vld [vmem:[%s4889_s5 + $0x48] sm:$0xff]  ;;  %v68_v10 = vld [vmem:[%s4889_s5 + $0x50] sm:$0xff]  ;;  %v70_v11 = vld [vmem:[%s4889_s5 + $0x58] sm:$0xff] }
   0x5   :  { %55 = vst [vmem:[#allocation3 + $0x18] sm:$0xff] %v54_v3  ;;  %v72_v12 = vld [vmem:[%s4889_s5 + $0x60] sm:$0xff]  ;;  %v74_v13 = vld [vmem:[%s4889_s5 + $0x68] sm:$0xff]  ;;  %v76_v14 = vld [vmem:[%s4889_s5 + $0x70] sm:$0xff] }
   0x6   :  { %57 = vst [vmem:[#allocation3 + $0x50] sm:$0xff] %v56_v4  ;;  %v78_v15 = vld [vmem:[%s4889_s5 + $0x78] sm:$0xff]  ;;  %v80_v16 = vld [vmem:[%s4889_s5 + $0x80] sm:$0xff]  ;;  %v82_v17 = vld [vmem:[%s4889_s5 + $0x88] sm:$0xff] }
   0x7   :  { %59 = vst [vmem:[#allocation3 + $0x168] sm:$0xff] %v58_v5  ;;  %v84_v18 = vld [vmem:[%s4889_s5 + $0x90] sm:$0xff]  ;;  %v86_v19 = vld [vmem:[%s4889_s5 + $0x98] sm:$0xff]  ;;  %v88_v20 = vld [vmem:[%s4889_s5 + $0xa0] sm:$0xff] }
   0x8   :  { %61 = vst [vmem:[#allocation3 + $0x130] sm:$0xff] %v60_v6  ;;  %v90_v21 = vld [vmem:[%s4889_s5 + $0xa8] sm:$0xff]  ;;  %v92_v22 = vld [vmem:[%s4889_s5 + $0xb0] sm:$0xff]  ;;  %v94_v23 = vld [vmem:[%s4889_s5 + $0xb8] sm:$0xff] }
   0x9   :  { %63 = vst [vmem:[#allocation3 + $0x48] sm:$0xff] %v62_v7  ;;  %v96_v24 = vld [vmem:[%s4889_s5 + $0xc0] sm:$0xff]  ;;  %v98_v25 = vld [vmem:[%s4889_s5 + $0xc8] sm:$0xff]  ;;  %v100_v26 = vld [vmem:[%s4889_s5 + $0xd0] sm:$0xff] }
   0xa   :  { %65 = vst [vmem:[#allocation3 + $0x180] sm:$0xff] %v64_v8  ;;  %v102_v27 = vld [vmem:[%s4889_s5 + $0xd8] sm:$0xff]  ;;  %v104_v28 = vld [vmem:[%s4889_s5 + $0xe0] sm:$0xff]  ;;  %v106_v29 = vld [vmem:[%s4889_s5 + $0xe8] sm:$0xff] }
   0xb   :  { %67 = vst [vmem:[#allocation3 + $0x110] sm:$0xff] %v66_v9  ;;  %v108_v30 = vld [vmem:[%s4889_s5 + $0xf0] sm:$0xff]  ;;  %v110_v31 = vld [vmem:[%s4889_s5 + $0xf8] sm:$0xff]  ;;  %v112_v32 = vld [vmem:[%s4889_s5 + $0x100] sm:$0xff] }
   0xc   :  { %69 = vst [vmem:[#allocation3 + $0x118] sm:$0xff] %v68_v10  ;;  %v114_v33 = vld [vmem:[%s4889_s5 + $0x108] sm:$0xff]  ;;  %v116_v34 = vld [vmem:[%s4889_s5 + $0x110] sm:$0xff]  ;;  %v118_v35 = vld [vmem:[%s4889_s5 + $0x118] sm:$0xff] }
   0xd   :  { %71 = vst [vmem:[#allocation3 + $0x98] sm:$0xff] %v70_v11  ;;  %v120_v36 = vld [vmem:[%s4889_s5 + $0x120] sm:$0xff]  ;;  %v122_v37 = vld [vmem:[%s4889_s5 + $0x128] sm:$0xff]  ;;  %v124_v38 = vld [vmem:[%s4889_s5 + $0x130] sm:$0xff] }
   0xe   :  { %73 = vst [vmem:[#allocation3 + $0x120] sm:$0xff] %v72_v12  ;;  %v126_v39 = vld [vmem:[%s4889_s5 + $0x138] sm:$0xff]  ;;  %v128_v40 = vld [vmem:[%s4889_s5 + $0x140] sm:$0xff]  ;;  %v130_v41 = vld [vmem:[%s4889_s5 + $0x148] sm:$0xff] }
   0xf   :  { %75 = vst [vmem:[#allocation3 + $0x150] sm:$0xff] %v74_v13  ;;  %v132_v42 = vld [vmem:[%s4889_s5 + $0x150] sm:$0xff]  ;;  %v134_v43 = vld [vmem:[%s4889_s5 + $0x158] sm:$0xff]  ;;  %v136_v44 = vld [vmem:[%s4889_s5 + $0x160] sm:$0xff] }
  0x10   :  { %77 = vst [vmem:[#allocation3 + $0x108] sm:$0xff] %v76_v14  ;;  %v138_v45 = vld [vmem:[%s4889_s5 + $0x168] sm:$0xff]  ;;  %v140_v46 = vld [vmem:[%s4889_s5 + $0x170] sm:$0xff]  ;;  %v142_v47 = vld [vmem:[%s4889_s5 + $0x178] sm:$0xff] }
  0x11   :  { %79 = vst [vmem:[#allocation3 + $0x60] sm:$0xff] %v78_v15  ;;  %v144_v48 = vld [vmem:[%s4889_s5 + $0x180] sm:$0xff]  ;;  %v146_v49 = vld [vmem:[%s4889_s5 + $0x188] sm:$0xff]  ;;  %v148_v50 = vld [vmem:[%s4889_s5 + $0x190] sm:$0xff] }
  0x12   :  { %81 = vst [vmem:[#allocation3 + $0xe0] sm:$0xff] %v80_v16  ;;  %v150_v51 = vld [vmem:[%s4889_s5 + $0x198] sm:$0xff]  ;;  %v152_v52 = vld [vmem:[%s4889_s5 + $0x1a0] sm:$0xff]  ;;  %v154_v53 = vld [vmem:[%s4889_s5 + $0x1a8] sm:$0xff] }
  0x13   :  { %83 = vst [vmem:[#allocation3 + $0x188] sm:$0xff] %v82_v17  ;;  %v156_v54 = vld [vmem:[%s4889_s5 + $0x1b0] sm:$0xff]  ;;  %v158_v55 = vld [vmem:[%s4889_s5 + $0x1b8] sm:$0xff]  ;;  %v160_v56 = vld [vmem:[%s4889_s5 + $0x1c0] sm:$0xff] }
  0x14   :  { %85 = vst [vmem:[#allocation3 + $0x138] sm:$0xff] %v84_v18  ;;  %v162_v57 = vld [vmem:[%s4889_s5 + $0x1c8] sm:$0xff]  ;;  %v164_v58 = vld [vmem:[%s4889_s5 + $0x1d0] sm:$0xff]  ;;  %v166_v59 = vld [vmem:[%s4889_s5 + $0x1d8] sm:$0xff] }
  0x15   :  { %87 = vst [vmem:[#allocation3 + $0x140] sm:$0xff] %v86_v19  ;;  %v168_v60 = vld [vmem:[%s4889_s5 + $0x1e0] sm:$0xff]  ;;  %v170_v61 = vld [vmem:[%s4889_s5 + $0x1e8] sm:$0xff]  ;;  %v172_v62 = vld [vmem:[%s4889_s5 + $0x1f0] sm:$0xff] }
  0x16   :  { %89 = vst [vmem:[#allocation3 + $0x80] sm:$0xff] %v88_v20  ;;  %v174_v63 = vld [vmem:[%s4889_s5 + $0x1f8] sm:$0xff] }
  0x17   :  { %91 = vst [vmem:[#allocation3 + $0x1a8] sm:$0xff] %v90_v21 }
  0x18   :  { %93 = vst [vmem:[#allocation3 + $0x1b8] sm:$0xff] %v92_v22 }
  0x19   :  { %95 = vst [vmem:[#allocation3 + $0x28] sm:$0xff] %v94_v23 }
  0x1a   :  { %97 = vst [vmem:[#allocation3 + $0x1e8] sm:$0xff] %v96_v24 }
  0x1b   :  { %99 = vst [vmem:[#allocation3 + $0xf8] sm:$0xff] %v98_v25 }
  0x1c   :  { %101 = vst [vmem:[#allocation3 + $0x160] sm:$0xff] %v100_v26 }
  0x1d   :  { %103 = vst [vmem:[#allocation3 + $0x30] sm:$0xff] %v102_v27 }
  0x1e   :  { %105 = vst [vmem:[#allocation3 + $0x1e0] sm:$0xff] %v104_v28 }
  0x1f   :  { %107 = vst [vmem:[#allocation3] sm:$0xff] %v106_v29 }
  0x20   :  { %109 = vst [vmem:[#allocation3 + $0xf0] sm:$0xff] %v108_v30 }
  0x21   :  { %111 = vst [vmem:[#allocation3 + $0x8] sm:$0xff] %v110_v31 }
  0x22   :  { %113 = vst [vmem:[#allocation3 + $0x148] sm:$0xff] %v112_v32 }
  0x23   :  { %115 = vst [vmem:[#allocation3 + $0x1d0] sm:$0xff] %v114_v33 }
  0x24   :  { %117 = vst [vmem:[#allocation3 + $0x100] sm:$0xff] %v116_v34 }
  0x25   :  { %119 = vst [vmem:[#allocation3 + $0xc8] sm:$0xff] %v118_v35 }
  0x26   :  { %121 = vst [vmem:[#allocation3 + $0x40] sm:$0xff] %v120_v36 }
  0x27   :  { %123 = vst [vmem:[#allocation3 + $0x1f8] sm:$0xff] %v122_v37 }
  0x28   :  { %125 = vst [vmem:[#allocation3 + $0x20] sm:$0xff] %v124_v38 }
  0x29   :  { %127 = vst [vmem:[#allocation3 + $0x128] sm:$0xff] %v126_v39 }
  0x2a   :  { %129 = vst [vmem:[#allocation3 + $0x1a0] sm:$0xff] %v128_v40 }
  0x2b   :  { %131 = vst [vmem:[#allocation3 + $0x1f0] sm:$0xff] %v130_v41 }
  0x2c   :  { %133 = vst [vmem:[#allocation3 + $0xe8] sm:$0xff] %v132_v42 }
  0x2d   :  { %135 = vst [vmem:[#allocation3 + $0x78] sm:$0xff] %v134_v43 }
  0x2e   :  { %137 = vst [vmem:[#allocation3 + $0x70] sm:$0xff] %v136_v44 }
  0x2f   :  { %139 = vst [vmem:[#allocation3 + $0x90] sm:$0xff] %v138_v45 }
  0x30   :  { %141 = vst [vmem:[#allocation3 + $0x1d8] sm:$0xff] %v140_v46 }
  0x31   :  { %143 = vst [vmem:[#allocation3 + $0xd0] sm:$0xff] %v142_v47 }
  0x32   :  { %145 = vst [vmem:[#allocation3 + $0xb8] sm:$0xff] %v144_v48 }
  0x33   :  { %147 = vst [vmem:[#allocation3 + $0x88] sm:$0xff] %v146_v49 }
  0x34   :  { %149 = vst [vmem:[#allocation3 + $0xa8] sm:$0xff] %v148_v50 }
  0x35   :  { %151 = vst [vmem:[#allocation3 + $0x1c8] sm:$0xff] %v150_v51 }
  0x36   :  { %153 = vst [vmem:[#allocation3 + $0x170] sm:$0xff] %v152_v52 }
  0x37   :  { %155 = vst [vmem:[#allocation3 + $0x178] sm:$0xff] %v154_v53 }
  0x38   :  { %157 = vst [vmem:[#allocation3 + $0x68] sm:$0xff] %v156_v54 }
  0x39   :  { %159 = vst [vmem:[#allocation3 + $0x190] sm:$0xff] %v158_v55 }
  0x3a   :  { %161 = vst [vmem:[#allocation3 + $0x198] sm:$0xff] %v160_v56 }
  0x3b   :  { %163 = vst [vmem:[#allocation3 + $0x38] sm:$0xff] %v162_v57 }
  0x3c   :  { %165 = vst [vmem:[#allocation3 + $0xc0] sm:$0xff] %v164_v58 }
  0x3d   :  { %167 = vst [vmem:[#allocation3 + $0x1c0] sm:$0xff] %v166_v59 }
  0x3e   :  { %169 = vst [vmem:[#allocation3 + $0x158] sm:$0xff] %v168_v60 }
  0x3f   :  { %171 = vst [vmem:[#allocation3 + $0x10] sm:$0xff] %v170_v61 }
  0x40   :  { %173 = vst [vmem:[#allocation3 + $0x58] sm:$0xff] %v172_v62 }
  0x41   :  { %175 = vst [vmem:[#allocation3 + $0xa0] sm:$0xff] %v174_v63 }
  0x42   :  { %181 = vsyncadd [#allocation4], 8192  ;;  %v3102_v0 = vld [vmem:[%s4885_s1 + $0x8] sm:$0xf]  ;;  %v3650_v1 = vld [vmem:[%s4885_s1 + $0x8] sm:$0x30] }
  0x43   :  { %v3103_v2 = vor.u32 %v3650_v1, %v3102_v0  ;;  %vm518_vm0 = vcmask 1044480   ;;  %vm519_vm1 = vcmask 1045504   ;;  %v3787_v3 = vmov 65535   ;;  %v3649_v7 = vld [vmem:[%s4885_s1] sm:$0xff]  ;;  %v3618_v9 = vld [vmem:[%s4884_s0 + $0x8] sm:$0xff]  ;;  %v3619_v10 = vld [vmem:[%s4884_s0 + $0x10] sm:$0xff] }
  0x44   :  { %v520_v4 = vsel %vm518_vm0, 4294967295, %v3787_v3  ;;  %v3617_v8 = vld [vmem:[%s4884_s0] sm:$0xff]  ;;  %vm421_vm2 = vcmask 220160   ;;  %v3620_v11 = vld [vmem:[%s4884_s0 + $0x18] sm:$0xff]  ;;  %v3622_v13 = vld [vmem:[%s4884_s0 + $0x28] sm:$0xff]  ;;  %vm779_vm3 = vcmask 261120  }
  0x45   :  { %v521_v5 = vsel %vm519_vm1, %v520_v4, 0  ;;  %v3621_v12 = vld [vmem:[%s4884_s0 + $0x20] sm:$0xff]  ;;  %v3623_v14 = vld [vmem:[%s4884_s0 + $0x30] sm:$0xff]  ;;  %v3624_v15 = vld [vmem:[%s4884_s0 + $0x38] sm:$0xff]  ;;  %vm781_vm4 = vcmask 254976  }
  0x46   :  { %v523_v6 = vand.u32 %v3103_v2, %v521_v5  ;;  %v3625_v16 = vld [vmem:[%s4884_s0 + $0x40] sm:$0xff]  ;;  %v3626_v19 = vld [vmem:[%s4884_s0 + $0x48] sm:$0xff]  ;;  %v3627_v22 = vld [vmem:[%s4884_s0 + $0x50] sm:$0xff] }
  0x47   :  { %v3628_v25 = vld [vmem:[%s4884_s0 + $0x58] sm:$0xff]  ;;  %v3629_v28 = vld [vmem:[%s4884_s0 + $0x60] sm:$0xff]  ;;  %v3630_v31 = vld [vmem:[%s4884_s0 + $0x68] sm:$0xff] }
  0x48   :  { %531 = vmatpush.bf16.msra.mxu0 %v523_v6  ;;  %3749 = vmatpush.bf16.msra.mxu1 %v523_v6  ;;  %v3631_v34 = vld [vmem:[%s4884_s0 + $0x70] sm:$0xff]  ;;  %v3632_v37 = vld [vmem:[%s4884_s0 + $0x78] sm:$0xff]  ;;  %v3633_v40 = vld [vmem:[%s4884_s0 + $0x80] sm:$0xff] }
  0x49   :  { %v3634_v43 = vld [vmem:[%s4884_s0 + $0x88] sm:$0xff]  ;;  %v3635_v46 = vld [vmem:[%s4884_s0 + $0x90] sm:$0xff]  ;;  %v3636_v49 = vld [vmem:[%s4884_s0 + $0x98] sm:$0xff] }
  0x4a   :  { %v3637_v52 = vld [vmem:[%s4884_s0 + $0xa0] sm:$0xff]  ;;  %v3638_v55 = vld [vmem:[%s4884_s0 + $0xa8] sm:$0xff]  ;;  %v3648_v57 = vld [vmem:[%s4884_s0 + $0xf8] sm:$0xff] }
  0x4b   :  { %v3639_v59 = vld [vmem:[%s4884_s0 + $0xb0] sm:$0xff]  ;;  %v3640_v62 = vld [vmem:[%s4884_s0 + $0xb8] sm:$0xff]  ;;  %v3641_v1 = vld [vmem:[%s4884_s0 + $0xc0] sm:$0xff] }
  0x4c   :  { %532 = vmatpush.bf16.msra.mxu0 %v3649_v7  ;;  %3750 = vmatpush.bf16.msra.mxu1 %v3649_v7  ;;  %v3642_v4 = vld [vmem:[%s4884_s0 + $0xc8] sm:$0xff]  ;;  %v3643_v7 = vld [vmem:[%s4884_s0 + $0xd0] sm:$0xff] }
  0x4f   :  { %3104 = vmatmul.msk.bf16.vlgmr.msra.gmra.mxu0 %vm421_vm2, %v3617_v8  ;;  %3135 = vmatmul.msk.bf16.vlgmr.msra.gmra.mxu1 %vm421_vm2, %v3648_v57 }
  0x5f   :  { %3105 = vmatmul.msk.bf16.gmra.mxu0 %vm421_vm2, %v3618_v9 }
  0x6f   :  { %3106 = vmatmul.msk.bf16.gmra.mxu0 %vm421_vm2, %v3619_v10  ;;  %v3644_v10 = vld [vmem:[%s4884_s0 + $0xd8] sm:$0xff] }
  0x7f   :  { %3107 = vmatmul.msk.bf16.gmra.mxu0 %vm421_vm2, %v3620_v11 }
  0x8f   :  { %3108 = vmatmul.msk.bf16.gmra.mxu0 %vm421_vm2, %v3621_v12 }
  0x9f   :  { %3109 = vmatmul.msk.bf16.gmra.mxu0 %vm421_vm2, %v3622_v13  ;;  %v3645_v13 = vld [vmem:[%s4884_s0 + $0xe0] sm:$0xff] }
  0xaf   :  { %3110 = vmatmul.msk.bf16.gmra.mxu0 %vm421_vm2, %v3623_v14 }
  0xbf   :  { %3111 = vmatmul.msk.bf16.gmra.mxu0 %vm421_vm2, %v3624_v15 }
  0xcc   :  { %v4086_v17 = vpop.f32.mrf.mxu0 }
  0xcf   :  { %3112 = vmatmul.msk.bf16.gmra.mxu0 %vm421_vm2, %v3625_v16  ;;  %v3646_v16 = vld [vmem:[%s4884_s0 + $0xe8] sm:$0xff] }
  0xd4   :  { %v4089_v18 = vpop.f32.mrf.mxu0 }
  0xdc   :  { %v4094_v20 = vpop.f32.mrf.mxu0 }
  0xdf   :  { %3113 = vmatmul.msk.bf16.gmra.mxu0 %vm421_vm2, %v3626_v19 }
  0xe4   :  { %v4097_v21 = vpop.f32.mrf.mxu0 }
  0xec   :  { %v4102_v23 = vpop.f32.mrf.mxu0 }
  0xef   :  { %3114 = vmatmul.msk.bf16.gmra.mxu0 %vm421_vm2, %v3627_v22 }
  0xf4   :  { %v4105_v24 = vpop.f32.mrf.mxu0 }
  0xfc   :  { %v4110_v26 = vpop.f32.mrf.mxu0 }
  0xff   :  { %3115 = vmatmul.msk.bf16.gmra.mxu0 %vm421_vm2, %v3628_v25  ;;  %v3788_v25 = vmov 0.0  }
 0x100   :  { %806 = vst.msk [vmem:[#allocation2 + $0xa0] sm:$0xff] %vm779_vm3, %v3788_v25 }
 0x101   :  { %780 = vst.msk [vmem:[#allocation2 + $0x40] sm:$0xff] %vm779_vm3, %v3788_v25 }
 0x102   :  { %793 = vst.msk [vmem:[#allocation2 + $0x90] sm:$0xff] %vm779_vm3, %v3788_v25 }
 0x103   :  { %819 = vst.msk [vmem:[#allocation2 + $0xf0] sm:$0xff] %vm779_vm3, %v3788_v25 }
 0x104   :  { %v4113_v27 = vpop.f32.mrf.mxu0  ;;  %820 = vst.msk [vmem:[#allocation2 + $0xf8] sm:$0x3] %vm781_vm4, %v3788_v25 }
 0x105   :  { %782 = vst.msk [vmem:[#allocation2 + $0x48] sm:$0x3] %vm781_vm4, %v3788_v25 }
 0x106   :  { %783 = vst.msk [vmem:[#allocation2 + $0x8] sm:$0x3] %vm781_vm4, %v3788_v25 }
 0x107   :  { %784 = vst.msk [vmem:[#allocation2 + $0x18] sm:$0x3] %vm781_vm4, %v3788_v25 }
 0x108   :  { %785 = vst.msk [vmem:[#allocation2 + $0x28] sm:$0x3] %vm781_vm4, %v3788_v25 }
 0x109   :  { %786 = vst.msk [vmem:[#allocation2 + $0x38] sm:$0x3] %vm781_vm4, %v3788_v25 }
 0x10a   :  { %794 = vst.msk [vmem:[#allocation2 + $0x98] sm:$0x3] %vm781_vm4, %v3788_v25 }
 0x10b   :  { %796 = vst.msk [vmem:[#allocation2 + $0x50] sm:$0x3] %vm781_vm4, %v3788_v25 }
 0x10c   :  { %v4118_v29 = vpop.f32.mrf.mxu0  ;;  %797 = vst.msk [vmem:[#allocation2 + $0x60] sm:$0x3] %vm781_vm4, %v3788_v25 }
 0x10d   :  { %798 = vst.msk [vmem:[#allocation2 + $0x70] sm:$0x3] %vm781_vm4, %v3788_v25 }
 0x10e   :  { %799 = vst.msk [vmem:[#allocation2 + $0x80] sm:$0x3] %vm781_vm4, %v3788_v25 }
 0x10f   :  { %3116 = vmatmul.msk.bf16.gmra.mxu0 %vm421_vm2, %v3629_v28  ;;  %v3647_v28 = vld [vmem:[%s4884_s0 + $0xf0] sm:$0xff]  ;;  %800 = vst.msk [vmem:[#allocation2 + $0x90] sm:$0x3] %vm781_vm4, %v3788_v25 }
 0x110   :  { %807 = vst.msk [vmem:[#allocation2 + $0xa8] sm:$0x3] %vm781_vm4, %v3788_v25 }
 0x111   :  { %809 = vst.msk [vmem:[#allocation2 + $0xb8] sm:$0x3] %vm781_vm4, %v3788_v25 }
 0x112   :  { %810 = vst.msk [vmem:[#allocation2 + $0xc8] sm:$0x3] %vm781_vm4, %v3788_v25 }
 0x113   :  { %811 = vst.msk [vmem:[#allocation2 + $0xd8] sm:$0x3] %vm781_vm4, %v3788_v25 }
 0x114   :  { %v4121_v30 = vpop.f32.mrf.mxu0  ;;  %812 = vst.msk [vmem:[#allocation2 + $0xe8] sm:$0x3] %vm781_vm4, %v3788_v25 }
 0x115   :  { %821 = vst.msk [vmem:[#allocation2 + $0xf0] sm:$0x3] %vm781_vm4, %v3788_v25 }
 0x116   :  { %822 = vst.msk [vmem:[#allocation2 + $0x100] sm:$0x3] %vm781_vm4, %v3788_v25 }
 0x117   :  { %823 = vst.msk [vmem:[#allocation2 + $0x110] sm:$0x3] %vm781_vm4, %v3788_v25 }
 0x118   :  { %824 = vst.msk [vmem:[#allocation2 + $0x120] sm:$0x3] %vm781_vm4, %v3788_v25 }
 0x119   :  { %825 = vst.msk [vmem:[#allocation2 + $0x130] sm:$0x3] %vm781_vm4, %v3788_v25 }
 0x11a   :  { %787 = vst.msk [vmem:[#allocation2 + $0x48] sm:$0x3] %vm781_vm4, %v3788_v25 }
 0x11b   :  { %808 = vst.msk [vmem:[#allocation2 + $0xa8] sm:$0x3] %vm781_vm4, %v3788_v25 }
 0x11c   :  { %v4126_v32 = vpop.f32.mrf.mxu0 }
 0x11f   :  { %3117 = vmatmul.msk.bf16.gmra.mxu0 %vm421_vm2, %v3630_v31 }
 0x124   :  { %v4129_v33 = vpop.f32.mrf.mxu0 }
 0x12c   :  { %v4134_v35 = vpop.f32.mrf.mxu0 }
 0x12f   :  { %3118 = vmatmul.msk.bf16.gmra.mxu0 %vm421_vm2, %v3631_v34 }
 0x134   :  { %v4137_v36 = vpop.f32.mrf.mxu0 }
 0x13c   :  { %v4142_v38 = vpop.f32.mrf.mxu0 }
 0x13f   :  { %3119 = vmatmul.msk.bf16.gmra.mxu0 %vm421_vm2, %v3632_v37  ;;  %v689_v37 = vpop.f32.mrf.mxu1 }
 0x144   :  { %v4145_v39 = vpop.f32.mrf.mxu0 }
 0x147   :  { %v691_v57 = vpop.f32.mrf.mxu1 }
 0x14c   :  { %v4150_v41 = vpop.f32.mrf.mxu0 }
 0x14f   :  { %3120 = vmatmul.msk.bf16.gmra.mxu0 %vm421_vm2, %v3633_v40 }
 0x154   :  { %v4153_v42 = vpop.f32.mrf.mxu0 }
 0x15c   :  { %v4158_v44 = vpop.f32.mrf.mxu0 }
 0x15f   :  { %3121 = vmatmul.msk.bf16.gmra.mxu0 %vm421_vm2, %v3634_v43 }
 0x164   :  { %v4161_v45 = vpop.f32.mrf.mxu0 }
 0x16c   :  { %v4166_v47 = vpop.f32.mrf.mxu0 }
 0x16f   :  { %3122 = vmatmul.msk.bf16.gmra.mxu0 %vm421_vm2, %v3635_v46 }
 0x174   :  { %v4169_v48 = vpop.f32.mrf.mxu0 }
 0x17c   :  { %v4174_v50 = vpop.f32.mrf.mxu0 }
 0x17f   :  { %3123 = vmatmul.msk.bf16.gmra.mxu0 %vm421_vm2, %v3636_v49  ;;  %v4300_v49 = vld [vmem:[%s4886_s2] ss:$0 sm:$0xff] }
 0x184   :  { %v4177_v51 = vpop.f32.mrf.mxu0 }
 0x18c   :  { %v4182_v53 = vpop.f32.mrf.mxu0 }
 0x18f   :  { %3124 = vmatmul.msk.bf16.gmra.mxu0 %vm421_vm2, %v3637_v52 }
 0x194   :  { %v4185_v54 = vpop.f32.mrf.mxu0 }
 0x19c   :  { %v4190_v56 = vpop.f32.mrf.mxu0 }
 0x19f   :  { %3125 = vmatmul.msk.bf16.gmra.mxu0 %vm421_vm2, %v3638_v55 }
 0x1a4   :  { %v4197_v58 = vpop.f32.mrf.mxu0 }
 0x1ac   :  { %v4202_v60 = vpop.f32.mrf.mxu0 }
 0x1af   :  { %3126 = vmatmul.msk.bf16.gmra.mxu0 %vm421_vm2, %v3639_v59 }
 0x1b4   :  { %v4205_v61 = vpop.f32.mrf.mxu0 }
 0x1bc   :  { %v4210_v63 = vpop.f32.mrf.mxu0 }
 0x1bd   :  { %v708_v43 = vmax.f32 %v4142_v38, %v4210_v63 }
 0x1bf   :  { %3127 = vmatmul.msk.bf16.gmra.mxu0 %vm421_vm2, %v3640_v62 }
 0x1c4   :  { %v4213_v0 = vpop.f32.mrf.mxu0 }
 0x1c5   :  { %v709_v62 = vmax.f32 %v4145_v39, %v4213_v0  ;;  %v695_v0 = vmax.f32 %v4089_v18, %v4153_v42 }
 0x1cc   :  { %v4218_v2 = vpop.f32.mrf.mxu0 }
 0x1cf   :  { %3128 = vmatmul.msk.bf16.gmra.mxu0 %vm421_vm2, %v3641_v1 }
 0x1d4   :  { %v4221_v3 = vpop.f32.mrf.mxu0 }
 0x1dc   :  { %v4226_v5 = vpop.f32.mrf.mxu0 }
 0x1df   :  { %3129 = vmatmul.msk.bf16.gmra.mxu0 %vm421_vm2, %v3642_v4 }
 0x1e4   :  { %v4229_v6 = vpop.f32.mrf.mxu0 }
 0x1ec   :  { %v4234_v8 = vpop.f32.mrf.mxu0 }
 0x1ef   :  { %3130 = vmatmul.msk.bf16.gmra.mxu0 %vm421_vm2, %v3643_v7 }
 0x1f4   :  { %v4237_v9 = vpop.f32.mrf.mxu0 }
 0x1fc   :  { %v4242_v11 = vpop.f32.mrf.mxu0 }
 0x1ff   :  { %3131 = vmatmul.msk.bf16.gmra.mxu0 %vm421_vm2, %v3644_v10 }
 0x204   :  { %v4245_v12 = vpop.f32.mrf.mxu0 }
 0x20c   :  { %v4250_v14 = vpop.f32.mrf.mxu0 }
 0x20f   :  { %3132 = vmatmul.msk.bf16.gmra.mxu0 %vm421_vm2, %v3645_v13  ;;  %v694_v13 = vmax.f32 %v4086_v17, %v4150_v41 }
 0x214   :  { %v4253_v15 = vpop.f32.mrf.mxu0 }
 0x21c   :  { %v4258_v19 = vpop.f32.mrf.mxu0 }
 0x21f   :  { %3133 = vmatmul.msk.bf16.gmra.mxu0 %vm421_vm2, %v3646_v16 }
 0x224   :  { %v4261_v22 = vpop.f32.mrf.mxu0 }
 0x22c   :  { %v4273_v31 = vpop.f32.mrf.mxu0 }
 0x22f   :  { %3134 = vmatmul.msk.bf16.gmra.mxu0 %vm421_vm2, %v3647_v28 }
 0x234   :  { %v4284_v34 = vpop.f32.mrf.mxu0 }
 0x23c   :  { %v649_v40 = vpop.f32.mrf.mxu0 }
 0x23d   :  { %v724_v46 = vmax.f32 %v649_v40, %v689_v37 }
 0x23f   :  { %v740_v52 = vmax.f32 %v708_v43, %v724_v46 }
 0x241   :  { %v760_v55 = vadd.f32 %v4300_v49, %v740_v52 }
 0x243   :  { %v776_v59 = vmax.f32 %v760_v55, 0.0 }
 0x244   :  { %v651_v38 = vpop.f32.mrf.mxu0 }
 0x245   :  { %829 = vst.msk [vmem:[#allocation2 + $0x122] sm:$0xff] %vm779_vm3, %v776_v59  ;;  %v725_v63 = vmax.f32 %v651_v38, %v691_v57 }
 0x247   :  { %v741_v1 = vmax.f32 %v709_v62, %v725_v63 }
 0x249   :  { %v761_v4 = vadd.f32 %v4300_v49, %v741_v1 }
 0x24b   :  { %v777_v7 = vmax.f32 %v761_v4, 0.0 }
 0x24c   :  { %v654_v10 = vpop.f32.mrf.mxu0 }
 0x24d   :  { %830 = vst.msk [vmem:[#allocation2 + $0x132] sm:$0xff] %vm779_vm3, %v777_v7  ;;  %v710_v16 = vmax.f32 %v4218_v2, %v654_v10  ;;  %v696_v2 = vmax.f32 %v4094_v20, %v4158_v44 }
 0x24f   :  { %v726_v25 = vmax.f32 %v694_v13, %v710_v16  ;;  %v698_v13 = vmax.f32 %v4102_v23, %v4166_v47 }
 0x251   :  { %v746_v28 = vadd.f32 %v4300_v49, %v726_v25 }
 0x253   :  { %v762_v37 = vmax.f32 %v746_v28, 0.0 }
 0x254   :  { %v656_v39 = vpop.f32.mrf.mxu0 }
 0x255   :  { %788 = vst.msk [vmem:[#allocation2] sm:$0xff] %vm779_vm3, %v762_v37  ;;  %v711_v40 = vmax.f32 %v4221_v3, %v656_v39  ;;  %v697_v3 = vmax.f32 %v4097_v21, %v4161_v45 }
 0x257   :  { %v727_v43 = vmax.f32 %v695_v0, %v711_v40 }
 0x259   :  { %v747_v46 = vadd.f32 %v4300_v49, %v727_v43  ;;  %v699_v43 = vmax.f32 %v4105_v24, %v4169_v48  ;;  %v3653_v48 = vld [vmem:[%s4887_s3 + $0x10] sm:$0xff] }
 0x25b   :  { %v763_v17 = vmax.f32 %v747_v46, 0.0 }
 0x25c   :  { %v659_v41 = vpop.f32.mrf.mxu0 }
 0x25d   :  { %789 = vst.msk [vmem:[#allocation2 + $0x10] sm:$0xff] %vm779_vm3, %v763_v17  ;;  %v712_v52 = vmax.f32 %v4226_v5, %v659_v41 }
 0x25f   :  { %v728_v55 = vmax.f32 %v696_v2, %v712_v52  ;;  %v3654_v2 = vld [vmem:[%s4887_s3 + $0x18] sm:$0xff] }
 0x260   :  { %1071 = vmatpush.bf16.msrb.mxu1 %v3654_v2  ;;  %v3652_v2 = vld [vmem:[%s4887_s3 + $0x8] sm:$0xff] }
 0x261   :  { %v748_v57 = vadd.f32 %v4300_v49, %v728_v55  ;;  %1144 = vmatpush.bf16.msra.mxu2 %v3652_v2 }
 0x263   :  { %v764_v18 = vmax.f32 %v748_v57, 0.0  ;;  %v700_v57 = vmax.f32 %v4110_v26, %v4174_v50 }
 0x264   :  { %v661_v42 = vpop.f32.mrf.mxu0  ;;  %v872_v62 = vld [vmem:[#allocation2 + $0x10] sm:$0xff]  ;;  %1072 = vmatpush.bf16.msrb.mxu1 %v3653_v48 }
 0x265   :  { %790 = vst.msk [vmem:[#allocation2 + $0x20] sm:$0xff] %vm779_vm3, %v764_v18  ;;  %v713_v59 = vmax.f32 %v4229_v6, %v661_v42  ;;  %v888_v63 = vld [vmem:[#allocation2 + $0x12] sm:$0xff]  ;;  %v876_v44 = vpack.c.bf16 %v872_v62, %v872_v62 }
 0x266   :  { %v892_v5 = vpack.c.bf16 %v888_v63, %v888_v63 }
 0x267   :  { %v729_v38 = vmax.f32 %v697_v3, %v713_v59  ;;  %v4335_v16 = vunpack.c.l.b16 %v876_v44  ;;  %v701_v59 = vmax.f32 %v4113_v27, %v4177_v51 }
 0x268   :  { %v4339_v37 = vunpack.c.l.b16 %v892_v5 }
 0x269   :  { %v749_v20 = vadd.f32 %v4300_v49, %v729_v38 }
 0x26b   :  { %v765_v1 = vmax.f32 %v749_v20, 0.0 }
 0x26c   :  { %v664_v4 = vpop.f32.mrf.mxu0  ;;  %v873_v7 = vld [vmem:[#allocation2 + $0x20] sm:$0xff] }
 0x26d   :  { %v889_v10 = vld [vmem:[#allocation2 + $0x22] sm:$0xff]  ;;  %791 = vst.msk [vmem:[#allocation2 + $0x30] sm:$0xff] %vm779_vm3, %v765_v1  ;;  %v714_v21 = vmax.f32 %v4234_v8, %v664_v4  ;;  %v877_v45 = vpack.c.bf16 %v873_v7, %v873_v7  ;;  %v702_v7 = vmax.f32 %v4118_v29, %v4182_v53 }
 0x26e   :  { %v893_v6 = vpack.c.bf16 %v889_v10, %v889_v10 }
 0x26f   :  { %v730_v25 = vmax.f32 %v698_v13, %v714_v21  ;;  %v4337_v28 = vunpack.c.l.b16 %v877_v45 }
 0x270   :  { %v4341_v39 = vunpack.c.l.b16 %v893_v6 }
 0x271   :  { %v750_v0 = vadd.f32 %v4300_v49, %v730_v25  ;;  %v4346_v23 = vpack.c.b16 %v4337_v28, %v4335_v16 }
 0x272   :  { %v1825_v47 = vpack.c.b16 %v4341_v39, %v4339_v37 }
 0x273   :  { %v766_v8 = vmax.f32 %v750_v0, 0.0 }
 0x274   :  { %v666_v40 = vpop.f32.mrf.mxu0 }
 0x275   :  { %801 = vst.msk [vmem:[#allocation2 + $0x52] sm:$0xff] %vm779_vm3, %v766_v8  ;;  %v715_v46 = vmax.f32 %v4237_v9, %v666_v40  ;;  %v703_v8 = vmax.f32 %v4121_v30, %v4185_v54  ;;  %v704_v54 = vmax.f32 %v4126_v32, %v4190_v56 }
 0x277   :  { %v731_v17 = vmax.f32 %v699_v43, %v715_v46  ;;  %v839_v43 = vld [vmem:[#allocation2 + $0xa0] sm:$0xff] }
 0x279   :  { %v751_v41 = vadd.f32 %v4300_v49, %v731_v17 }
 0x27b   :  { %v767_v52 = vmax.f32 %v751_v41, 0.0  ;;  %v843_v41 = vpack.c.bf16 %v839_v43, %v839_v43 }
 0x27c   :  { %v669_v55 = vpop.f32.mrf.mxu0 }
 0x27d   :  { %802 = vst.msk [vmem:[#allocation2 + $0x62] sm:$0xff] %vm779_vm3, %v767_v52  ;;  %v716_v24 = vmax.f32 %v4242_v11, %v669_v55  ;;  %v3656_v52 = vld [vmem:[%s4887_s3 + $0x28] sm:$0xff]  ;;  %v975_v48 = vunpack.c.l.b16 %v843_v41 }
 0x27e   :  { %1241 = vmatpush.bf16.msra.mxu3 %v3656_v52 }
 0x27f   :  { %v732_v9 = vmax.f32 %v700_v57, %v716_v24 }
 0x281   :  { %v752_v18 = vadd.f32 %v4300_v49, %v732_v9  ;;  %v3651_v9 = vld [vmem:[%s4887_s3] sm:$0xff] }
 0x282   :  { %1145 = vmatpush.bf16.msra.mxu2 %v3651_v9 }
 0x283   :  { %v768_v42 = vmax.f32 %v752_v18, 0.0  ;;  %v3655_v18 = vld [vmem:[%s4887_s3 + $0x20] sm:$0xff] }
 0x284   :  { %v671_v3 = vpop.f32.mrf.mxu0  ;;  %v880_v38 = vld [vmem:[#allocation2 + $0x62] sm:$0xff]  ;;  %1242 = vmatpush.bf16.msra.mxu3 %v3655_v18 }
 0x285   :  { %803 = vst.msk [vmem:[#allocation2 + $0x72] sm:$0xff] %vm779_vm3, %v768_v42  ;;  %v717_v26 = vmax.f32 %v4245_v12, %v671_v3  ;;  %v864_v11 = vld [vmem:[#allocation2 + $0x60] sm:$0xff]  ;;  %v884_v63 = vpack.c.bf16 %v880_v38, %v880_v38  ;;  %v3660_v38 = vld [vmem:[%s4887_s3 + $0x48] sm:$0xff] }
 0x286   :  { %v868_v44 = vpack.c.bf16 %v864_v11, %v864_v11  ;;  %v3662_v11 = vld [vmem:[%s4887_s3 + $0x58] sm:$0xff]  ;;  %1451 = vmatpush.bf16.msrb.mxu2 %v3660_v38 }
 0x287   :  { %v733_v50 = vmax.f32 %v701_v59, %v717_v26  ;;  %v4375_v10 = vunpack.c.l.b16 %v884_v63  ;;  %v705_v63 = vmax.f32 %v4129_v33, %v4197_v58 }
 0x288   :  { %v4377_v21 = vunpack.c.l.b16 %v868_v44  ;;  %1548 = vmatpush.bf16.msrb.mxu3 %v3662_v11 }
 0x289   :  { %v753_v62 = vadd.f32 %v4300_v49, %v733_v50 }
 0x28b   :  { %v769_v20 = vmax.f32 %v753_v62, 0.0 }
 0x28c   :  { %v674_v1 = vpop.f32.mrf.mxu0  ;;  %v881_v5 = vld [vmem:[#allocation2 + $0x72] sm:$0xff] }
 0x28d   :  { %v865_v4 = vld [vmem:[#allocation2 + $0x70] sm:$0xff]  ;;  %804 = vst.msk [vmem:[#allocation2 + $0x82] sm:$0xff] %vm779_vm3, %v769_v20  ;;  %v718_v27 = vmax.f32 %v4250_v14, %v674_v1  ;;  %v885_v51 = vpack.c.bf16 %v881_v5, %v881_v5  ;;  %v3658_v1 = vld [vmem:[%s4887_s3 + $0x38] sm:$0xff] }
 0x28e   :  { %v869_v12 = vpack.c.bf16 %v865_v4, %v865_v4  ;;  %1354 = vmatpush.bf16.msra.mxu1 %v3658_v1 }
 0x28f   :  { %v734_v13 = vmax.f32 %v702_v7, %v718_v27  ;;  %v4379_v45 = vunpack.c.l.b16 %v885_v51 }
 0x290   :  { %v4381_v6 = vunpack.c.l.b16 %v869_v12 }
 0x291   :  { %v754_v25 = vadd.f32 %v4300_v49, %v734_v13  ;;  %v4388_v53 = vpack.c.b16 %v4379_v45, %v4375_v10 }
 0x292   :  { %v1615_v29 = vpack.c.b16 %v4381_v6, %v4377_v21 }
 0x293   :  { %v770_v14 = vmax.f32 %v754_v25, 0.0 }
 0x294   :  { %v676_v0 = vpop.f32.mrf.mxu0 }
 0x295   :  { %814 = vst.msk [vmem:[#allocation2 + $0xb0] sm:$0xff] %vm779_vm3, %v770_v14  ;;  %v719_v40 = vmax.f32 %v4253_v15, %v676_v0  ;;  %v706_v0 = vmax.f32 %v4134_v35, %v4202_v60  ;;  %v707_v35 = vmax.f32 %v4137_v36, %v4205_v61 }
 0x297   :  { %v735_v46 = vmax.f32 %v703_v8, %v719_v40 }
 0x299   :  { %v755_v17 = vadd.f32 %v4300_v49, %v735_v46 }
 0x29b   :  { %v771_v55 = vmax.f32 %v755_v17, 0.0 }
 0x29c   :  { %v679_v57 = vpop.f32.mrf.mxu0  ;;  %v840_v30 = vld [vmem:[#allocation2 + $0xb0] sm:$0xff] }
 0x29d   :  { %815 = vst.msk [vmem:[#allocation2 + $0xc0] sm:$0xff] %vm779_vm3, %v771_v55  ;;  %v720_v15 = vmax.f32 %v4258_v19, %v679_v57  ;;  %v844_v24 = vpack.c.bf16 %v840_v30, %v840_v30  ;;  %v856_v59 = vld [vmem:[#allocation2 + $0xb2] sm:$0xff] }
 0x29e   :  { %v860_v62 = vpack.c.bf16 %v856_v59, %v856_v59  ;;  %v831_v55 = vld [vmem:[#allocation2 + $0xf0] sm:$0xff] }
 0x29f   :  { %v736_v42 = vmax.f32 %v704_v54, %v720_v15  ;;  %v976_v3 = vunpack.c.l.b16 %v844_v24  ;;  %v835_v15 = vpack.c.bf16 %v831_v55, %v831_v55 }
 0x2a0   :  { %v4429_v51 = vunpack.c.l.b16 %v860_v62  ;;  %v850_v62 = vld [vmem:[#allocation2 + $0x122] sm:$0xff] }
 0x2a1   :  { %v756_v32 = vadd.f32 %v4300_v49, %v736_v42  ;;  %v4412_v56 = vpack.c.b16 %v976_v3, %v975_v48  ;;  %v965_v36 = vunpack.c.l.b16 %v835_v15  ;;  %v854_v1 = vpack.c.bf16 %v850_v62, %v850_v62  ;;  %v863_v15 = vld [vmem:[#allocation2 + $0x50] sm:$0xff] }
 0x2a3   :  { %v772_v19 = vmax.f32 %v756_v32, 0.0  ;;  %3144 = vmatmul.msk.bf16.vlgmr.msrb.gmra.mxu1 %vm779_vm3, %v4412_v56 }
 0x2a4   :  { %v681_v26 = vpop.f32.mrf.mxu0  ;;  %v841_v50 = vld [vmem:[#allocation2 + $0xc0] sm:$0xff] }
 0x2a5   :  { %816 = vst.msk [vmem:[#allocation2 + $0xd0] sm:$0xff] %vm779_vm3, %v772_v19  ;;  %v721_v20 = vmax.f32 %v4261_v22, %v681_v26  ;;  %v845_v44 = vpack.c.bf16 %v841_v50, %v841_v50  ;;  %v857_v5 = vld [vmem:[#allocation2 + $0xc2] sm:$0xff] }
 0x2a6   :  { %v861_v4 = vpack.c.bf16 %v857_v5, %v857_v5 }
 0x2a7   :  { %v737_v7 = vmax.f32 %v705_v63, %v721_v20  ;;  %v977_v27 = vunpack.c.l.b16 %v845_v44  ;;  %v834_v63 = vld [vmem:[#allocation2 + $0x120] sm:$0xff] }
 0x2a8   :  { %v4431_v12 = vunpack.c.l.b16 %v861_v4  ;;  %v838_v5 = vpack.c.bf16 %v834_v63, %v834_v63  ;;  %v4465_v4 = vunpack.c.l.b16 %v854_v1  ;;  %v3664_v63 = vld [vmem:[%s4887_s3 + $0x68] sm:$0xff] }
 0x2a9   :  { %v757_v33 = vadd.f32 %v4300_v49, %v737_v7  ;;  %v4434_v58 = vpack.c.b16 %v977_v27, %v976_v3 }
 0x2aa   :  { %v4438_v22 = vpack.c.b16 %v4431_v12, %v4429_v51  ;;  %v4467_v7 = vunpack.c.l.b16 %v838_v5 }
 0x2ab   :  { %v773_v13 = vmax.f32 %v757_v33, 0.0 }
 0x2ac   :  { %v684_v25 = vpop.f32.mrf.mxu0  ;;  %v842_v14 = vld [vmem:[#allocation2 + $0xd0] sm:$0xff] }
 0x2ad   :  { %817 = vst.msk [vmem:[#allocation2 + $0xe0] sm:$0xff] %vm779_vm3, %v773_v13  ;;  %v722_v8 = vmax.f32 %v4273_v31, %v684_v25  ;;  %v846_v40 = vpack.c.bf16 %v842_v14, %v842_v14  ;;  %v847_v31 = vld [vmem:[#allocation2 + $0xf2] sm:$0xff]  ;;  %v855_v13 = vld [vmem:[#allocation2 + $0xa2] sm:$0xff] }
 0x2ae   :  { %v851_v54 = vpack.c.bf16 %v847_v31, %v847_v31  ;;  %v871_v25 = vld [vmem:[#allocation2] sm:$0xff]  ;;  %v859_v14 = vpack.c.bf16 %v855_v13, %v855_v13 }
 0x2af   :  { %v738_v43 = vmax.f32 %v706_v0, %v722_v8  ;;  %v4444_v46 = vunpack.c.l.b16 %v846_v40  ;;  %v875_v0 = vpack.c.bf16 %v871_v25, %v871_v25 }
 0x2b0   :  { %v1009_v42 = vunpack.c.l.b16 %v851_v54  ;;  %v1191_v8 = vunpack.c.l.b16 %v859_v14  ;;  %v879_v54 = vld [vmem:[#allocation2 + $0x52] sm:$0xff] }
 0x2b1   :  { %v758_v17 = vadd.f32 %v4300_v49, %v738_v43  ;;  %v4448_v41 = vpack.c.b16 %v4444_v46, %v977_v27  ;;  %v995_v40 = vunpack.c.l.b16 %v875_v0 }
 0x2b3   :  { %v774_v2 = vmax.f32 %v758_v17, 0.0  ;;  %3145 = vmatmul.msk.bf16.gmra.mxu1 %vm779_vm3, %v4448_v41  ;;  %v4475_v43 = vpack.c.b16 %v4335_v16, %v995_v40  ;;  %v1195_v17 = vpack.c.b16 %v4429_v51, %v1191_v8  ;;  %v3657_v16 = vld [vmem:[%s4887_s3 + $0x30] sm:$0xff] }
 0x2b4   :  { %v686_v52 = vpop.f32.mrf.mxu0  ;;  %v874_v51 = vld [vmem:[#allocation2 + $0x30] sm:$0xff]  ;;  %1355 = vmatpush.bf16.msra.mxu1 %v3657_v16 }
 0x2b5   :  { %827 = vst.msk [vmem:[#allocation2 + $0x102] sm:$0xff] %vm779_vm3, %v774_v2  ;;  %v723_v60 = vmax.f32 %v4284_v34, %v686_v52  ;;  %v3659_v2 = vld [vmem:[%s4887_s3 + $0x40] sm:$0xff]  ;;  %v3661_v52 = vld [vmem:[%s4887_s3 + $0x50] sm:$0xff] }
 0x2b6   :  { %1452 = vmatpush.bf16.msrb.mxu2 %v3659_v2  ;;  %1549 = vmatpush.bf16.msrb.mxu3 %v3661_v52 }
 0x2b7   :  { %v739_v57 = vmax.f32 %v707_v35, %v723_v60  ;;  %v858_v35 = vld [vmem:[#allocation2 + $0xd2] sm:$0xff] }
 0x2b8   :  { %v862_v60 = vpack.c.bf16 %v858_v35, %v858_v35  ;;  %1661 = vmatpush.bf16.msrb.mxu1 %v3664_v63 }
 0x2b9   :  { %v759_v30 = vadd.f32 %v4300_v49, %v739_v57 }
 0x2ba   :  { %v4494_v55 = vunpack.c.l.b16 %v862_v60 }
 0x2bb   :  { %v775_v24 = vmax.f32 %v759_v30, 0.0 }
 0x2bc   :  { %v848_v48 = vld [vmem:[#allocation2 + $0x102] sm:$0xff]  ;;  %v1196_v30 = vpack.c.b16 %v4494_v55, %v4431_v12 }
 0x2bd   :  { %v832_v9 = vld [vmem:[#allocation2 + $0x100] sm:$0xff]  ;;  %828 = vst.msk [vmem:[#allocation2 + $0x112] sm:$0xff] %vm779_vm3, %v775_v24  ;;  %v852_v18 = vpack.c.bf16 %v848_v48, %v848_v48  ;;  %v883_v24 = vpack.c.bf16 %v879_v54, %v879_v54  ;;  %v867_v48 = vpack.c.bf16 %v863_v15, %v863_v15 }
 0x2be   :  { %v836_v3 = vpack.c.bf16 %v832_v9, %v832_v9  ;;  %v882_v12 = vld [vmem:[#allocation2 + $0x82] sm:$0xff] }
 0x2bf   :  { %v1010_v61 = vunpack.c.l.b16 %v852_v18  ;;  %v1019_v9 = vunpack.c.l.b16 %v883_v24  ;;  %v985_v18 = vunpack.c.l.b16 %v867_v48 }
 0x2c0   :  { %v966_v32 = vunpack.c.l.b16 %v836_v3  ;;  %v886_v3 = vpack.c.bf16 %v882_v12, %v882_v12 }
 0x2c1   :  { %v1013_v59 = vpack.c.b16 %v1010_v61, %v1009_v42  ;;  %v989_v42 = vpack.c.b16 %v4377_v21, %v985_v18 }
 0x2c2   :  { %v969_v34 = vpack.c.b16 %v966_v32, %v965_v36 }
 0x2c3   :  { %3146 = vmatmul.msk.bf16.gmra.mxu1 %vm779_vm3, %v1013_v59  ;;  %3176 = vmatmul.msk.bf16.vlgmr.msra.gmra.mxu3 %vm779_vm3, %v1013_v59 }
 0x2c4   :  { %3160 = vmatmul.msk.bf16.vlgmr.msra.gmra.mxu2 %vm779_vm3, %v969_v34  ;;  %v849_v49 = vld [vmem:[#allocation2 + $0x112] sm:$0xff]  ;;  %v887_v34 = vld [vmem:[#allocation2 + $0x2] sm:$0xff] }
 0x2c5   :  { %v833_v19 = vld [vmem:[#allocation2 + $0x110] sm:$0xff]  ;;  %v853_v26 = vpack.c.bf16 %v849_v49, %v849_v49  ;;  %v891_v49 = vpack.c.bf16 %v887_v34, %v887_v34 }
 0x2c6   :  { %v837_v50 = vpack.c.bf16 %v833_v19, %v833_v19 }
 0x2c7   :  { %v1011_v38 = vunpack.c.l.b16 %v853_v26  ;;  %v1201_v26 = vunpack.c.l.b16 %v891_v49  ;;  %v3663_v49 = vld [vmem:[%s4887_s3 + $0x60] sm:$0xff] }
 0x2c8   :  { %v967_v11 = vunpack.c.l.b16 %v837_v50  ;;  %1662 = vmatpush.bf16.msrb.mxu1 %v3663_v49 }
 0x2c9   :  { %v4463_v44 = vpack.c.b16 %v1011_v38, %v1010_v61  ;;  %v1014_v27 = vpack.c.b16 %v4465_v4, %v1011_v38  ;;  %v4516_v61 = vunpack.c.l.b16 %v886_v3  ;;  %v1205_v50 = vpack.c.b16 %v4339_v37, %v1201_v26  ;;  %v3668_v38 = vld [vmem:[%s4887_s3 + $0x88] sm:$0xff] }
 0x2ca   :  { %v4461_v20 = vpack.c.b16 %v967_v11, %v966_v32  ;;  %v970_v33 = vpack.c.b16 %v4467_v7, %v967_v11  ;;  %1855 = vmatpush.bf16.msra.mxu3 %v3668_v38  ;;  %v890_v11 = vld [vmem:[#allocation2 + $0x32] sm:$0xff] }
 0x2cb   :  { %v894_v1 = vpack.c.bf16 %v890_v11, %v890_v11 }
 0x2cd   :  { %v4545_v5 = vunpack.c.l.b16 %v894_v1 }
 0x2d3   :  { %3147 = vmatmul.msk.bf16.gmra.mxu1 %vm779_vm3, %v1014_v27  ;;  %3177 = vmatmul.msk.bf16.gmra.mxu3 %vm779_vm3, %v1014_v27 }
 0x2d4   :  { %3161 = vmatmul.msk.bf16.gmra.mxu2 %vm779_vm3, %v970_v33  ;;  %v1206_v33 = vpack.c.b16 %v4545_v5, %v4341_v39 }
 0x2e3   :  { %3148 = vmatmul.msk.bf16.gmra.mxu1 %vm779_vm3, %v4475_v43  ;;  %3178 = vmatmul.msk.bf16.gmra.mxu3 %vm779_vm3, %v1195_v17 }
 0x2e4   :  { %3162 = vmatmul.msk.bf16.gmra.mxu2 %vm779_vm3, %v4412_v56  ;;  %v878_v56 = vpack.c.bf16 %v874_v51, %v874_v51 }
 0x2e6   :  { %v4492_v31 = vunpack.c.l.b16 %v878_v56 }
 0x2e8   :  { %v4498_v57 = vpack.c.b16 %v4492_v31, %v4337_v28  ;;  %v4508_v28 = vpack.c.b16 %v4375_v10, %v1019_v9  ;;  %v4522_v10 = vpack.c.b16 %v4516_v61, %v4379_v45  ;;  %v3666_v45 = vld [vmem:[%s4887_s3 + $0x78] sm:$0xff] }
 0x2e9   :  { %1758 = vmatpush.bf16.msra.mxu2 %v3666_v45 }
 0x2f3   :  { %3149 = vmatmul.msk.bf16.gmra.mxu1 %vm779_vm3, %v4498_v57  ;;  %3179 = vmatmul.msk.bf16.gmra.mxu3 %vm779_vm3, %v1196_v30 }
 0x2f4   :  { %3163 = vmatmul.msk.bf16.gmra.mxu2 %vm779_vm3, %v4448_v41  ;;  %v866_v41 = vld [vmem:[#allocation2 + $0x80] sm:$0xff] }
 0x2f5   :  { %v870_v36 = vpack.c.bf16 %v866_v41, %v866_v41  ;;  %v898_v41 = vld [vmem:[#allocation2 + $0x130] sm:$0xff] }
 0x2f7   :  { %v4518_v32 = vunpack.c.l.b16 %v870_v36 }
 0x2f9   :  { %v990_v59 = vpack.c.b16 %v4518_v32, %v4381_v6 }
 0x303   :  { %3150 = vmatmul.msk.bf16.gmra.mxu1 %vm779_vm3, %v4508_v28  ;;  %3180 = vmatmul.msk.bf16.gmra.mxu3 %vm779_vm3, %v4508_v28 }
 0x304   :  { %3164 = vmatmul.msk.bf16.gmra.mxu2 %vm779_vm3, %v989_v42 }
 0x313   :  { %3151 = vmatmul.msk.bf16.gmra.mxu1 %vm779_vm3, %v4522_v10  ;;  %3181 = vmatmul.msk.bf16.gmra.mxu3 %vm779_vm3, %v4522_v10 }
 0x314   :  { %3165 = vmatmul.msk.bf16.gmra.mxu2 %vm779_vm3, %v990_v59 }
 0x320   :  { %v1074_v19 = vpop.f32.mrf.mxu1 }
 0x323   :  { %3192 = vmatmul.msk.bf16.vlgmr.msra.gmra.mxu1 %vm779_vm3, %v989_v42  ;;  %3182 = vmatmul.msk.bf16.gmra.mxu3 %vm779_vm3, %v1205_v50  ;;  %v3667_v42 = vld [vmem:[%s4887_s3 + $0x80] sm:$0xff] }
 0x324   :  { %3166 = vmatmul.msk.bf16.gmra.mxu2 %vm779_vm3, %v4475_v43  ;;  %1856 = vmatpush.bf16.msra.mxu3 %v3667_v42 }
 0x328   :  { %v1076_v62 = vpop.f32.mrf.mxu1 }
 0x330   :  { %v1079_v27 = vpop.f32.mrf.mxu1 }
 0x333   :  { %3193 = vmatmul.msk.bf16.gmra.mxu1 %vm779_vm3, %v990_v59  ;;  %3183 = vmatmul.msk.bf16.gmra.mxu3 %vm779_vm3, %v1206_v33 }
 0x334   :  { %3167 = vmatmul.msk.bf16.gmra.mxu2 %vm779_vm3, %v4498_v57 }
 0x338   :  { %v1081_v13 = vpop.f32.mrf.mxu1 }
 0x340   :  { %v1084_v25 = vpop.f32.mrf.mxu1 }
 0x343   :  { %3194 = vmatmul.msk.bf16.gmra.mxu1 %vm779_vm3, %v4475_v43  ;;  %3224 = vmatmul.msk.bf16.vlgmr.msrb.gmra.mxu3 %vm779_vm3, %v4508_v28 }
 0x344   :  { %3208 = vmatmul.msk.bf16.vlgmr.msrb.gmra.mxu2 %vm779_vm3, %v4475_v43 }
 0x346   :  { %v1244_v8 = vpop.f32.mrf.mxu3 }
 0x347   :  { %v1147_v14 = vpop.f32.mrf.mxu2 }
 0x348   :  { %v1148_v0 = vadd.f32 %v1147_v14, %v1074_v19  ;;  %v1086_v40 = vpop.f32.mrf.mxu1 }
 0x34a   :  { %v4559_v17 = vadd.f32 %v1244_v8, %v1148_v0 }
 0x34e   :  { %v1246_v16 = vpop.f32.mrf.mxu3 }
 0x34f   :  { %v1149_v2 = vpop.f32.mrf.mxu2 }
 0x350   :  { %v1150_v52 = vadd.f32 %v1149_v2, %v1076_v62  ;;  %v1089_v51 = vpop.f32.mrf.mxu1 }
 0x352   :  { %v4561_v35 = vadd.f32 %v1246_v16, %v1150_v52  ;;  %v914_v16 = vld [vmem:[#allocation2 + $0x132] sm:$0xff] }
 0x353   :  { %3195 = vmatmul.msk.bf16.gmra.mxu1 %vm779_vm3, %v4498_v57  ;;  %3225 = vmatmul.msk.bf16.gmra.mxu3 %vm779_vm3, %v4522_v10 }
 0x354   :  { %3209 = vmatmul.msk.bf16.gmra.mxu2 %vm779_vm3, %v4498_v57  ;;  %v3665_v57 = vld [vmem:[%s4887_s3 + $0x70] sm:$0xff] }
 0x355   :  { %1759 = vmatpush.bf16.msra.mxu2 %v3665_v57 }
 0x356   :  { %v1249_v60 = vpop.f32.mrf.mxu3 }
 0x357   :  { %v1152_v43 = vpop.f32.mrf.mxu2 }
 0x358   :  { %v1153_v56 = vadd.f32 %v1152_v43, %v1079_v27  ;;  %v1091_v30 = vpop.f32.mrf.mxu1 }
 0x35a   :  { %v4569_v54 = vadd.f32 %v1249_v60, %v1153_v56  ;;  %v918_v60 = vpack.c.bf16 %v914_v16, %v914_v16 }
 0x35e   :  { %v1251_v48 = vpop.f32.mrf.mxu3 }
 0x35f   :  { %v1154_v15 = vpop.f32.mrf.mxu2 }
 0x360   :  { %v1155_v24 = vadd.f32 %v1154_v15, %v1081_v13  ;;  %v1094_v9 = vpop.f32.mrf.mxu1 }
 0x362   :  { %v4571_v18 = vadd.f32 %v1251_v48, %v1155_v24  ;;  %v1420_v24 = vunpack.c.l.b16 %v918_v60 }
 0x363   :  { %3196 = vmatmul.msk.bf16.gmra.mxu1 %vm779_vm3, %v4461_v20  ;;  %3226 = vmatmul.msk.bf16.gmra.mxu3 %vm779_vm3, %v1205_v50 }
 0x364   :  { %3210 = vmatmul.msk.bf16.gmra.mxu2 %vm779_vm3, %v4508_v28  ;;  %v902_v28 = vpack.c.bf16 %v898_v41, %v898_v41 }
 0x366   :  { %v1254_v36 = vpop.f32.mrf.mxu3  ;;  %v1307_v19 = vunpack.c.l.b16 %v902_v28 }
 0x367   :  { %v1157_v12 = vpop.f32.mrf.mxu2 }
 0x368   :  { %v1158_v3 = vadd.f32 %v1157_v12, %v1084_v25  ;;  %v1096_v59 = vpop.f32.mrf.mxu1  ;;  %v4592_v62 = vpack.c.b16 %v1307_v19, %v4467_v7 }
 0x36a   :  { %v4584_v34 = vadd.f32 %v1254_v36, %v1158_v3 }
 0x36e   :  { %v1256_v45 = vpop.f32.mrf.mxu3 }
 0x36f   :  { %v1159_v26 = vpop.f32.mrf.mxu2 }
 0x370   :  { %v1160_v50 = vadd.f32 %v1159_v26, %v1086_v40  ;;  %v1099_v38 = vpop.f32.mrf.mxu1 }
 0x372   :  { %v4589_v11 = vadd.f32 %v1256_v45, %v1160_v50 }
 0x373   :  { %3197 = vmatmul.msk.bf16.gmra.mxu1 %vm779_vm3, %v4592_v62  ;;  %3227 = vmatmul.msk.bf16.gmra.mxu3 %vm779_vm3, %v1206_v33  ;;  %v906_v33 = vld [vmem:[#allocation2 + $0xe0] sm:$0xff] }
 0x374   :  { %3211 = vmatmul.msk.bf16.gmra.mxu2 %vm779_vm3, %v4522_v10  ;;  %v910_v56 = vpack.c.bf16 %v906_v33, %v906_v33 }
 0x376   :  { %v1259_v27 = vpop.f32.mrf.mxu3 }
 0x377   :  { %v1162_v63 = vpop.f32.mrf.mxu2 }
 0x378   :  { %v1163_v1 = vadd.f32 %v1162_v63, %v1089_v51  ;;  %v1101_v13 = vpop.f32.mrf.mxu1 }
 0x37a   :  { %v4599_v25 = vadd.f32 %v1259_v27, %v1163_v1  ;;  %v922_v27 = vld [vmem:[#allocation2 + $0xe2] sm:$0xff] }
 0x37e   :  { %v1261_v8 = vpop.f32.mrf.mxu3 }
 0x37f   :  { %v1164_v14 = vpop.f32.mrf.mxu2 }
 0x380   :  { %v1165_v0 = vadd.f32 %v1164_v14, %v1091_v30  ;;  %v1104_v40 = vpop.f32.mrf.mxu1  ;;  %v1317_v30 = vunpack.c.l.b16 %v910_v56 }
 0x382   :  { %v4601_v7 = vadd.f32 %v1261_v8, %v1165_v0  ;;  %v4614_v41 = vpack.c.b16 %v1317_v30, %v4444_v46  ;;  %v926_v8 = vpack.c.bf16 %v922_v27, %v922_v27 }
 0x383   :  { %3198 = vmatmul.msk.bf16.gmra.mxu1 %vm779_vm3, %v4434_v58  ;;  %3228 = vmatmul.msk.bf16.gmra.mxu3 %vm779_vm3, %v4463_v44 }
 0x384   :  { %3212 = vmatmul.msk.bf16.gmra.mxu2 %vm779_vm3, %v4434_v58 }
 0x386   :  { %v1264_v52 = vpop.f32.mrf.mxu3 }
 0x387   :  { %v1167_v10 = vpop.f32.mrf.mxu2 }
 0x388   :  { %v1168_v2 = vadd.f32 %v1167_v10, %v1094_v9  ;;  %v1106_v51 = vpop.f32.mrf.mxu1  ;;  %v4617_v9 = vpack.c.b16 %v1420_v24, %v4465_v4  ;;  %v1517_v10 = vunpack.c.l.b16 %v926_v8 }
 0x38a   :  { %v4609_v43 = vadd.f32 %v1264_v52, %v1168_v2  ;;  %v4643_v56 = vpack.c.b16 %v1517_v10, %v4494_v55 }
 0x38e   :  { %v1266_v57 = vpop.f32.mrf.mxu3 }
 0x38f   :  { %v1169_v15 = vpop.f32.mrf.mxu2 }
 0x390   :  { %v1170_v48 = vadd.f32 %v1169_v15, %v1096_v59  ;;  %v1109_v42 = vpop.f32.mrf.mxu1 }
 0x392   :  { %v4611_v12 = vadd.f32 %v1266_v57, %v1170_v48 }
 0x393   :  { %3199 = vmatmul.msk.bf16.gmra.mxu1 %vm779_vm3, %v4614_v41  ;;  %3229 = vmatmul.msk.bf16.gmra.mxu3 %vm779_vm3, %v4617_v9 }
 0x394   :  { %3213 = vmatmul.msk.bf16.gmra.mxu2 %vm779_vm3, %v4614_v41 }
 0x396   :  { %v1269_v59 = vpop.f32.mrf.mxu3 }
 0x397   :  { %v1172_v3 = vpop.f32.mrf.mxu2 }
 0x398   :  { %v1173_v36 = vadd.f32 %v1172_v3, %v1099_v38  ;;  %v1111_v28 = vpop.f32.mrf.mxu1 }
 0x39a   :  { %v4625_v49 = vadd.f32 %v1269_v59, %v1173_v36 }
 0x39e   :  { %v1271_v26 = vpop.f32.mrf.mxu3 }
 0x39f   :  { %v1174_v46 = vpop.f32.mrf.mxu2 }
 0x3a0   :  { %v1175_v19 = vadd.f32 %v1174_v46, %v1101_v13  ;;  %v1357_v4 = vpop.f32.mrf.mxu1 }
 0x3a1   :  { %v1397_v45 = vadd.f32 %v1357_v4, %v4559_v17 }
 0x3a2   :  { %v4627_v50 = vadd.f32 %v1271_v26, %v1175_v19 }
 0x3a3   :  { %3240 = vmatmul.msk.bf16.vlgmr.msrb.gmra.mxu1 %vm779_vm3, %v4461_v20  ;;  %3230 = vmatmul.msk.bf16.gmra.mxu3 %vm779_vm3, %v4438_v22 }
 0x3a4   :  { %3214 = vmatmul.msk.bf16.gmra.mxu2 %vm779_vm3, %v4463_v44 }
 0x3a6   :  { %v1274_v1 = vpop.f32.mrf.mxu3 }
 0x3a7   :  { %v1177_v38 = vpop.f32.mrf.mxu2 }
 0x3a8   :  { %v1178_v63 = vadd.f32 %v1177_v38, %v1104_v40  ;;  %v1359_v13 = vpop.f32.mrf.mxu1 }
 0x3a9   :  { %v1398_v0 = vadd.f32 %v1359_v13, %v4561_v35 }
 0x3aa   :  { %v4636_v14 = vadd.f32 %v1274_v1, %v1178_v63 }
 0x3ae   :  { %v1276_v2 = vpop.f32.mrf.mxu3 }
 0x3af   :  { %v1179_v17 = vpop.f32.mrf.mxu2 }
 0x3b0   :  { %v1180_v33 = vadd.f32 %v1179_v17, %v1106_v51  ;;  %v1362_v52 = vpop.f32.mrf.mxu1 }
 0x3b1   :  { %v1399_v20 = vadd.f32 %v1362_v52, %v4569_v54 }
 0x3b2   :  { %v4639_v16 = vadd.f32 %v1276_v2, %v1180_v33 }
 0x3b3   :  { %3241 = vmatmul.msk.bf16.gmra.mxu1 %vm779_vm3, %v4592_v62  ;;  %3231 = vmatmul.msk.bf16.gmra.mxu3 %vm779_vm3, %v4643_v56 }
 0x3b4   :  { %3215 = vmatmul.msk.bf16.gmra.mxu2 %vm779_vm3, %v4617_v9 }
 0x3b6   :  { %v1279_v51 = vpop.f32.mrf.mxu3 }
 0x3b7   :  { %v1182_v35 = vpop.f32.mrf.mxu2 }
 0x3b8   :  { %v1183_v40 = vadd.f32 %v1182_v35, %v1109_v42  ;;  %v1364_v60 = vpop.f32.mrf.mxu1 }
 0x3b9   :  { %v1400_v54 = vadd.f32 %v1364_v60, %v4571_v18 }
 0x3ba   :  { %v4651_v30 = vadd.f32 %v1279_v51, %v1183_v40 }
 0x3be   :  { %v1281_v24 = vpop.f32.mrf.mxu3 }
 0x3bf   :  { %v1184_v15 = vpop.f32.mrf.mxu2 }
 0x3c0   :  { %v1185_v55 = vadd.f32 %v1184_v15, %v1111_v28  ;;  %v1367_v48 = vpop.f32.mrf.mxu1 }
 0x3c1   :  { %v1401_v3 = vadd.f32 %v1367_v48, %v4584_v34 }
 0x3c2   :  { %v4654_v57 = vadd.f32 %v1281_v24, %v1185_v55 }
 0x3c3   :  { %3242 = vmatmul.msk.bf16.gmra.mxu1 %vm779_vm3, %v4434_v58  ;;  %3272 = vmatmul.msk.bf16.vlgmr.msra.gmra.mxu3 %vm779_vm3, %v4463_v44 }
 0x3c4   :  { %3256 = vmatmul.msk.bf16.vlgmr.msra.gmra.mxu2 %vm779_vm3, %v4434_v58 }
 0x3c6   :  { %v1551_v18 = vpop.f32.mrf.mxu3 }
 0x3c7   :  { %v1454_v62 = vpop.f32.mrf.mxu2 }
 0x3c8   :  { %v1494_v42 = vadd.f32 %v1454_v62, %v1397_v45  ;;  %v1369_v36 = vpop.f32.mrf.mxu1 }
 0x3c9   :  { %v1402_v28 = vadd.f32 %v1369_v36, %v4589_v11 }
 0x3ca   :  { %v4663_v59 = vadd.f32 %v1551_v18, %v1494_v42 }
 0x3ce   :  { %v1553_v34 = vpop.f32.mrf.mxu3 }
 0x3cf   :  { %v1456_v46 = vpop.f32.mrf.mxu2 }
 0x3d0   :  { %v1495_v19 = vadd.f32 %v1456_v46, %v1398_v0  ;;  %v1372_v26 = vpop.f32.mrf.mxu1 }
 0x3d1   :  { %v1403_v38 = vadd.f32 %v1372_v26, %v4599_v25 }
 0x3d2   :  { %v4666_v4 = vadd.f32 %v1553_v34, %v1495_v19 }
 0x3d3   :  { %3243 = vmatmul.msk.bf16.gmra.mxu1 %vm779_vm3, %v4614_v41  ;;  %3273 = vmatmul.msk.bf16.gmra.mxu3 %vm779_vm3, %v4617_v9 }
 0x3d4   :  { %3257 = vmatmul.msk.bf16.gmra.mxu2 %vm779_vm3, %v4614_v41  ;;  %v931_v41 = vld [vmem:[#allocation2 + $0x90] sm:$0xff] }
 0x3d5   :  { %v935_v35 = vpack.c.bf16 %v931_v41, %v931_v41 }
 0x3d6   :  { %v1556_v11 = vpop.f32.mrf.mxu3 }
 0x3d7   :  { %v1459_v58 = vpop.f32.mrf.mxu2  ;;  %v1614_v40 = vunpack.c.l.b16 %v935_v35 }
 0x3d8   :  { %v1496_v45 = vadd.f32 %v1459_v58, %v1399_v20  ;;  %v1374_v63 = vpop.f32.mrf.mxu1 }
 0x3d9   :  { %v1404_v27 = vadd.f32 %v1374_v63, %v4601_v7 }
 0x3da   :  { %v4675_v1 = vadd.f32 %v1556_v11, %v1496_v45 }
 0x3de   :  { %v1558_v25 = vpop.f32.mrf.mxu3 }
 0x3df   :  { %v1461_v13 = vpop.f32.mrf.mxu2 }
 0x3e0   :  { %v1497_v0 = vadd.f32 %v1461_v13, %v1400_v54  ;;  %v1377_v8 = vpop.f32.mrf.mxu1 }
 0x3e1   :  { %v1405_v10 = vadd.f32 %v1377_v8, %v4609_v43 }
 0x3e2   :  { %v4678_v17 = vadd.f32 %v1558_v25, %v1497_v0 }
 0x3e3   :  { %3244 = vmatmul.msk.bf16.gmra.mxu1 %vm779_vm3, %v1615_v29  ;;  %3274 = vmatmul.msk.bf16.gmra.mxu3 %vm779_vm3, %v4438_v22  ;;  %v1616_v22 = vpack.c.b16 %v1614_v40, %v4518_v32 }
 0x3e4   :  { %3258 = vmatmul.msk.bf16.gmra.mxu2 %vm779_vm3, %v4463_v44 }
 0x3e6   :  { %v1561_v2 = vpop.f32.mrf.mxu3 }
 0x3e7   :  { %v1464_v7 = vpop.f32.mrf.mxu2 }
 0x3e8   :  { %v1498_v33 = vadd.f32 %v1464_v7, %v1401_v3  ;;  %v1379_v52 = vpop.f32.mrf.mxu1 }
 0x3e9   :  { %v1406_v43 = vadd.f32 %v1379_v52, %v4611_v12 }
 0x3ea   :  { %v4689_v20 = vadd.f32 %v1561_v2, %v1498_v33 }
 0x3ee   :  { %v1563_v29 = vpop.f32.mrf.mxu3 }
 0x3ef   :  { %v1466_v21 = vpop.f32.mrf.mxu2 }
 0x3f0   :  { %v1499_v6 = vadd.f32 %v1466_v21, %v1402_v28  ;;  %v1382_v51 = vpop.f32.mrf.mxu1  ;;  %v948_v28 = vld [vmem:[#allocation2 + $0x92] sm:$0xff] }
 0x3f1   :  { %v1407_v44 = vadd.f32 %v1382_v51, %v4625_v49  ;;  %v952_v26 = vpack.c.bf16 %v948_v28, %v948_v28 }
 0x3f2   :  { %v4692_v60 = vadd.f32 %v1563_v29, %v1499_v6 }
 0x3f3   :  { %3245 = vmatmul.msk.bf16.gmra.mxu1 %vm779_vm3, %v1616_v22  ;;  %3275 = vmatmul.msk.bf16.gmra.mxu3 %vm779_vm3, %v4643_v56  ;;  %v940_v56 = vld [vmem:[#allocation2 + $0x40] sm:$0xff]  ;;  %v1727_v45 = vunpack.c.l.b16 %v952_v26 }
 0x3f4   :  { %3259 = vmatmul.msk.bf16.gmra.mxu2 %vm779_vm3, %v4617_v9 }
 0x3f5   :  { %v1729_v25 = vpack.c.b16 %v1727_v45, %v4516_v61 }
 0x3f6   :  { %v1566_v15 = vpop.f32.mrf.mxu3 }
 0x3f7   :  { %v1469_v12 = vpop.f32.mrf.mxu2 }
 0x3f8   :  { %v1500_v54 = vadd.f32 %v1469_v12, %v1403_v38  ;;  %v1384_v55 = vpop.f32.mrf.mxu1 }
 0x3f9   :  { %v1408_v48 = vadd.f32 %v1384_v55, %v4627_v50 }
 0x3fa   :  { %v4701_v24 = vadd.f32 %v1566_v15, %v1500_v54 }
 0x3fe   :  { %v1568_v62 = vpop.f32.mrf.mxu3 }
 0x3ff   :  { %v1471_v3 = vpop.f32.mrf.mxu2 }
 0x400   :  { %v1501_v49 = vadd.f32 %v1471_v3, %v1404_v27  ;;  %v1387_v32 = vpop.f32.mrf.mxu1 }
 0x401   :  { %v1409_v18 = vadd.f32 %v1387_v32, %v4636_v14  ;;  %v944_v14 = vpack.c.bf16 %v940_v56, %v940_v56 }
 0x402   :  { %v4704_v42 = vadd.f32 %v1568_v62, %v1501_v49 }
 0x403   :  { %3246 = vmatmul.msk.bf16.gmra.mxu1 %vm779_vm3, %v4346_v23  ;;  %3276 = vmatmul.msk.bf16.gmra.mxu3 %vm779_vm3, %v4388_v53  ;;  %v1624_v38 = vunpack.c.l.b16 %v944_v14 }
 0x404   :  { %3260 = vmatmul.msk.bf16.gmra.mxu2 %vm779_vm3, %v4346_v23 }
 0x405   :  { %v1626_v0 = vpack.c.b16 %v1624_v38, %v4492_v31 }
 0x406   :  { %v1571_v36 = vpop.f32.mrf.mxu3 }
 0x407   :  { %v1474_v9 = vpop.f32.mrf.mxu2 }
 0x408   :  { %v1502_v50 = vadd.f32 %v1474_v9, %v1405_v10  ;;  %v1389_v46 = vpop.f32.mrf.mxu1 }
 0x409   :  { %v1410_v34 = vadd.f32 %v1389_v46, %v4639_v16 }
 0x40a   :  { %v4713_v19 = vadd.f32 %v1571_v36, %v1502_v50 }
 0x40e   :  { %v1573_v23 = vpop.f32.mrf.mxu3 }
 0x40f   :  { %v1476_v58 = vpop.f32.mrf.mxu2 }
 0x410   :  { %v1503_v11 = vadd.f32 %v1476_v58, %v1406_v43  ;;  %v1392_v63 = vpop.f32.mrf.mxu1 }
 0x411   :  { %v1411_v13 = vadd.f32 %v1392_v63, %v4651_v30 }
 0x412   :  { %v4716_v27 = vadd.f32 %v1573_v23, %v1503_v11 }
 0x413   :  { %3247 = vmatmul.msk.bf16.gmra.mxu1 %vm779_vm3, %v1626_v0  ;;  %3277 = vmatmul.msk.bf16.gmra.mxu3 %vm779_vm3, %v1729_v25 }
 0x414   :  { %3261 = vmatmul.msk.bf16.gmra.mxu2 %vm779_vm3, %v1626_v0 }
 0x416   :  { %v1576_v10 = vpop.f32.mrf.mxu3 }
 0x417   :  { %v1479_v16 = vpop.f32.mrf.mxu2 }
 0x418   :  { %v1504_v8 = vadd.f32 %v1479_v16, %v1407_v44  ;;  %v1394_v7 = vpop.f32.mrf.mxu1 }
 0x419   :  { %v1412_v33 = vadd.f32 %v1394_v7, %v4654_v57  ;;  %v956_v57 = vld [vmem:[#allocation2 + $0x42] sm:$0xff] }
 0x41a   :  { %v4724_v41 = vadd.f32 %v1576_v10, %v1504_v8  ;;  %v960_v44 = vpack.c.bf16 %v956_v57, %v956_v57 }
 0x41e   :  { %v1578_v52 = vpop.f32.mrf.mxu3 }
 0x41f   :  { %v1481_v2 = vpop.f32.mrf.mxu2 }
 0x420   :  { %v1505_v30 = vadd.f32 %v1481_v2, %v1408_v48  ;;  %v1664_v31 = vpop.f32.mrf.mxu1 }
 0x421   :  { %v1704_v61 = vadd.f32 %v1664_v31, %v4663_v59  ;;  %v1824_v59 = vunpack.c.l.b16 %v960_v44 }
 0x422   :  { %v4727_v43 = vadd.f32 %v1578_v52, %v1505_v30 }
 0x423   :  { %3278 = vmatmul.msk.bf16.gmra.mxu3 %vm779_vm3, %v1825_v47  ;;  %v1826_v39 = vpack.c.b16 %v1824_v59, %v4545_v5 }
 0x424   :  { %3262 = vmatmul.msk.bf16.gmra.mxu2 %vm779_vm3, %v4388_v53 }
 0x426   :  { %v1581_v21 = vpop.f32.mrf.mxu3 }
 0x427   :  { %v1484_v35 = vpop.f32.mrf.mxu2 }
 0x428   :  { %v1506_v40 = vadd.f32 %v1484_v35, %v1409_v18  ;;  %v1666_v6 = vpop.f32.mrf.mxu1 }
 0x429   :  { %v1705_v51 = vadd.f32 %v1666_v6, %v4666_v4 }
 0x42a   :  { %v4736_v29 = vadd.f32 %v1581_v21, %v1506_v40 }
 0x42e   :  { %v1583_v54 = vpop.f32.mrf.mxu3 }
 0x42f   :  { %v1486_v22 = vpop.f32.mrf.mxu2 }
 0x430   :  { %v1507_v12 = vadd.f32 %v1486_v22, %v1410_v34  ;;  %v1669_v53 = vpop.f32.mrf.mxu1 }
 0x431   :  { %v1706_v37 = vadd.f32 %v1669_v53, %v4675_v1 }
 0x432   :  { %v4739_v15 = vadd.f32 %v1583_v54, %v1507_v12 }
 0x433   :  { %3279 = vmatmul.msk.bf16.gmra.mxu3 %vm779_vm3, %v1826_v39 }
 0x434   :  { %3263 = vmatmul.msk.bf16.gmra.mxu2 %vm779_vm3, %v1729_v25 }
 0x436   :  { %v1586_v48 = vpop.f32.mrf.mxu3 }
 0x437   :  { %v1489_v47 = vpop.f32.mrf.mxu2 }
 0x438   :  { %v1508_v55 = vadd.f32 %v1489_v47, %v1411_v13  ;;  %v1671_v4 = vpop.f32.mrf.mxu1 }
 0x439   :  { %v1707_v49 = vadd.f32 %v1671_v4, %v4678_v17 }
 0x43a   :  { %v4745_v3 = vadd.f32 %v1586_v48, %v1508_v55 }
 0x43e   :  { %v1588_v18 = vpop.f32.mrf.mxu3 }
 0x43f   :  { %v1491_v62 = vpop.f32.mrf.mxu2 }
 0x440   :  { %v1509_v32 = vadd.f32 %v1491_v62, %v1412_v33  ;;  %v1674_v9 = vpop.f32.mrf.mxu1 }
 0x441   :  { %v1708_v5 = vadd.f32 %v1674_v9, %v4689_v20 }
 0x442   :  { %v4748_v56 = vadd.f32 %v1588_v18, %v1509_v32 }
 0x446   :  { %v1858_v36 = vpop.f32.mrf.mxu3 }
 0x447   :  { %v1761_v1 = vpop.f32.mrf.mxu2 }
 0x448   :  { %v1801_v50 = vadd.f32 %v1761_v1, %v1704_v61  ;;  %v1676_v28 = vpop.f32.mrf.mxu1 }
 0x449   :  { %v1709_v34 = vadd.f32 %v1676_v28, %v4692_v60 }
 0x44a   :  { %v4751_v46 = vadd.f32 %v1858_v36, %v1801_v50 }
 0x44e   :  { %v1860_v38 = vpop.f32.mrf.mxu3 }
 0x44f   :  { %v1763_v14 = vpop.f32.mrf.mxu2 }
 0x450   :  { %v1802_v26 = vadd.f32 %v1763_v14, %v1705_v51  ;;  %v1679_v17 = vpop.f32.mrf.mxu1 }
 0x451   :  { %v1710_v45 = vadd.f32 %v1679_v17, %v4701_v24 }
 0x452   :  { %v4754_v58 = vadd.f32 %v1860_v38, %v1802_v26 }
 0x456   :  { %v1863_v63 = vpop.f32.mrf.mxu3 }
 0x457   :  { %v1766_v11 = vpop.f32.mrf.mxu2 }
 0x458   :  { %v1803_v23 = vadd.f32 %v1766_v11, %v1706_v37  ;;  %v1681_v20 = vpop.f32.mrf.mxu1 }
 0x459   :  { %v1711_v0 = vadd.f32 %v1681_v20, %v4704_v42 }
 0x45a   :  { %v4757_v13 = vadd.f32 %v1863_v63, %v1803_v23 }
 0x45e   :  { %v1865_v8 = vpop.f32.mrf.mxu3 }
 0x45f   :  { %v1768_v25 = vpop.f32.mrf.mxu2 }
 0x460   :  { %v1804_v16 = vadd.f32 %v1768_v25, %v1707_v49  ;;  %v1684_v40 = vpop.f32.mrf.mxu1 }
 0x462   :  { %v4760_v60 = vadd.f32 %v1865_v8, %v1804_v16 }
 0x466   :  { %v1868_v33 = vpop.f32.mrf.mxu3 }
 0x467   :  { %v1771_v10 = vpop.f32.mrf.mxu2 }
 0x468   :  { %v1805_v7 = vadd.f32 %v1771_v10, %v1708_v5  ;;  %v1686_v44 = vpop.f32.mrf.mxu1  ;;  %v1712_v5 = vadd.f32 %v1684_v40, %v4713_v19 }
 0x469   :  { %v1713_v38 = vadd.f32 %v1686_v44, %v4716_v27 }
 0x46a   :  { %v1902_v2 = vadd.f32 %v1868_v33, %v1805_v7 }
 0x46c   :  { %v1914_v30 = vmax.f32 %v4751_v46, %v1902_v2 }
 0x46e   :  { %v1870_v31 = vpop.f32.mrf.mxu3 }
 0x46f   :  { %v1773_v24 = vpop.f32.mrf.mxu2 }
 0x470   :  { %v1806_v52 = vadd.f32 %v1773_v24, %v1709_v34  ;;  %v1689_v47 = vpop.f32.mrf.mxu1 }
 0x471   :  { %v1714_v27 = vadd.f32 %v1689_v47, %v4724_v41 }
 0x472   :  { %v1903_v61 = vadd.f32 %v1870_v31, %v1806_v52 }
 0x474   :  { %v1915_v35 = vmax.f32 %v4754_v58, %v1903_v61  ;;  %v3755_v58 = vld [vmem:[%s4888_s4] ss:$0 sm:$0xff] }
 0x476   :  { %v1873_v57 = vpop.f32.mrf.mxu3 }
 0x477   :  { %v1776_v21 = vpop.f32.mrf.mxu2 }
 0x478   :  { %v1807_v42 = vadd.f32 %v1776_v21, %v1710_v45  ;;  %v1691_v4 = vpop.f32.mrf.mxu1 }
 0x479   :  { %v1715_v40 = vadd.f32 %v1691_v4, %v4727_v43 }
 0x47a   :  { %v1904_v6 = vadd.f32 %v1873_v57, %v1807_v42 }
 0x47c   :  { %v1916_v51 = vmax.f32 %v4757_v13, %v1904_v6 }
 0x47e   :  { %v1875_v12 = vpop.f32.mrf.mxu3 }
 0x47f   :  { %v1778_v22 = vpop.f32.mrf.mxu2 }
 0x480   :  { %v1808_v59 = vadd.f32 %v1778_v22, %v1711_v0  ;;  %v1694_v32 = vpop.f32.mrf.mxu1 }
 0x481   :  { %v1716_v1 = vadd.f32 %v1694_v32, %v4736_v29 }
 0x482   :  { %v4765_v54 = vadd.f32 %v1875_v12, %v1808_v59 }
 0x484   :  { %v1917_v53 = vmax.f32 %v4760_v60, %v4765_v54 }
 0x486   :  { %v1878_v39 = vpop.f32.mrf.mxu3 }
 0x487   :  { %v1781_v37 = vpop.f32.mrf.mxu2 }
 0x488   :  { %v1809_v50 = vadd.f32 %v1781_v37, %v1712_v5  ;;  %v1696_v36 = vpop.f32.mrf.mxu1 }
 0x489   :  { %v1717_v45 = vadd.f32 %v1696_v36, %v4739_v15 }
 0x48a   :  { %v1906_v14 = vadd.f32 %v1878_v39, %v1809_v50 }
 0x48e   :  { %v1880_v48 = vpop.f32.mrf.mxu3 }
 0x48f   :  { %v1783_v55 = vpop.f32.mrf.mxu2 }
 0x490   :  { %v1810_v11 = vadd.f32 %v1783_v55, %v1713_v38  ;;  %v1699_v13 = vpop.f32.mrf.mxu1 }
 0x491   :  { %v1718_v60 = vadd.f32 %v1699_v13, %v4745_v3 }
 0x492   :  { %v1907_v0 = vadd.f32 %v1880_v48, %v1810_v11 }
 0x496   :  { %v1883_v62 = vpop.f32.mrf.mxu3 }
 0x497   :  { %v1786_v49 = vpop.f32.mrf.mxu2 }
 0x498   :  { %v1811_v10 = vadd.f32 %v1786_v49, %v1714_v27  ;;  %v1701_v61 = vpop.f32.mrf.mxu1 }
 0x499   :  { %v1719_v42 = vadd.f32 %v1701_v61, %v4748_v56 }
 0x49a   :  { %v1908_v24 = vadd.f32 %v1883_v62, %v1811_v10 }
 0x49e   :  { %v1885_v9 = vpop.f32.mrf.mxu3 }
 0x49f   :  { %v1788_v18 = vpop.f32.mrf.mxu2 }
 0x4a0   :  { %v1812_v41 = vadd.f32 %v1788_v18, %v1715_v40 }
 0x4a2   :  { %v1909_v22 = vadd.f32 %v1885_v9, %v1812_v41 }
 0x4a6   :  { %v1888_v34 = vpop.f32.mrf.mxu3 }
 0x4a7   :  { %v1791_v28 = vpop.f32.mrf.mxu2 }
 0x4a8   :  { %v1813_v46 = vadd.f32 %v1791_v28, %v1716_v1 }
 0x4aa   :  { %v1910_v26 = vadd.f32 %v1888_v34, %v1813_v46 }
 0x4ac   :  { %v1918_v17 = vmax.f32 %v1906_v14, %v1910_v26 }
 0x4ae   :  { %v1922_v19 = vmax.f32 %v1914_v30, %v1918_v17  ;;  %v1890_v20 = vpop.f32.mrf.mxu3 }
 0x4af   :  { %v1793_v23 = vpop.f32.mrf.mxu2 }
 0x4b0   :  { %v1930_v29 = vadd.f32 %v3755_v58, %v1922_v19  ;;  %v1814_v63 = vadd.f32 %v1793_v23, %v1717_v45 }
 0x4b2   :  { %v4776_v25 = vmax.f32 %v1930_v29, 0.0  ;;  %v1911_v16 = vadd.f32 %v1890_v20, %v1814_v63 }
 0x4b4   :  { %v1919_v8 = vmax.f32 %v1907_v0, %v1911_v16 }
 0x4b6   :  { %v1923_v7 = vmax.f32 %v1915_v35, %v1919_v8  ;;  %v1893_v30 = vpop.f32.mrf.mxu3 }
 0x4b7   :  { %v1796_v33 = vpop.f32.mrf.mxu2 }
 0x4b8   :  { %v1931_v15 = vadd.f32 %v3755_v58, %v1923_v7  ;;  %v1815_v2 = vadd.f32 %v1796_v33, %v1718_v60 }
 0x4ba   :  { %v4780_v52 = vmax.f32 %v1931_v15, 0.0  ;;  %v1912_v31 = vadd.f32 %v1893_v30, %v1815_v2 }
 0x4bc   :  { %v1920_v21 = vmax.f32 %v1908_v24, %v1912_v31 }
 0x4be   :  { %v1924_v57 = vmax.f32 %v1916_v51, %v1920_v21  ;;  %v1895_v35 = vpop.f32.mrf.mxu3 }
 0x4bf   :  { %v1798_v6 = vpop.f32.mrf.mxu2 }
 0x4c0   :  { %v1932_v3 = vadd.f32 %v3755_v58, %v1924_v57  ;;  %v1816_v44 = vadd.f32 %v1798_v6, %v1719_v42 }
 0x4c2   :  { %v4784_v59 = vmax.f32 %v1932_v3, 0.0  ;;  %v1913_v12 = vadd.f32 %v1895_v35, %v1816_v44 }
 0x4c4   :  { %v1921_v54 = vmax.f32 %v1909_v22, %v1913_v12 }
 0x4c6   :  { %v1925_v37 = vmax.f32 %v1917_v53, %v1921_v54 }
 0x4c8   :  { %v1933_v39 = vadd.f32 %v3755_v58, %v1925_v37 }
 0x4ca   :  { %v4786_v47 = vmax.f32 %v1933_v39, 0.0 }
 0x4cb   :  { %3783 = dma.done.wait [#allocation4], 8192 }
 0x4cc   :  { %3784 = vsyncadd [#allocation4], 4294959104  ;;  %v3676_v43 = vld [vmem:[#allocation3 + $0x48] sm:$0xff]  ;;  %v3672_v55 = vld [vmem:[#allocation3 + $0x18] sm:$0xff]  ;;  %v1946_v32 = vrot.slane %v4776_v25, 2  ;;  %v1947_v1 = vrot.slane %v4776_v25, 4  ;;  %v1970_v34 = vpack.c.bf16 %v4776_v25, %v4776_v25  ;;  %v2169_v8 = vpack.c.bf16 %v4780_v52, %v4780_v52 }
 0x4cd   :  { %v3680_v56 = vld [vmem:[#allocation3 + $0x98] sm:$0xff]  ;;  %2020 = vmatpush.bf16.msra.mxu1 %v3676_v43  ;;  %2060 = vmatpush.bf16.msrb.mxu2 %v3672_v55  ;;  %v3675_v51 = vld [vmem:[#allocation3 + $0x130] sm:$0xff]  ;;  %v3674_v49 = vld [vmem:[#allocation3 + $0x168] sm:$0xff]  ;;  %vm2012_vm5 = vcmask 523264   ;;  %v1948_v63 = vrot.slane %v4776_v25, 6  ;;  %v1949_v0 = vrot.slane %v4780_v52, 2  ;;  %v2369_v35 = vpack.c.bf16 %v4784_v59, %v4784_v59 }
 0x4ce   :  { %v3671_v48 = vld [vmem:[#allocation3 + $0xd8] sm:$0xff]  ;;  %2109 = vmatpush.bf16.msrb.mxu3 %v3680_v56  ;;  %v3670_v62 = vld [vmem:[#allocation3 + $0x1b0] sm:$0xff]  ;;  %v3677_v5 = vld [vmem:[#allocation3 + $0x180] sm:$0xff]  ;;  %v1979_v46 = vpack.c.bf16 %v1946_v32, %v1946_v32  ;;  %v2069_v14 = vpack.c.bf16 %v1947_v1, %v1947_v1  ;;  %v1950_v21 = vrot.slane %v4780_v52, 4  ;;  %v1951_v42 = vrot.slane %v4780_v52, 6  ;;  %s3789_s19 = smov [#allocation5]  }
 0x4cf   :  { %v3679_v4 = vld [vmem:[#allocation3 + $0x118] sm:$0xff]  ;;  %v3678_v53 = vld [vmem:[#allocation3 + $0x110] sm:$0xff]  ;;  %v3684_v50 = vld [vmem:[#allocation3 + $0x60] sm:$0xff]  ;;  %v2119_v27 = vpack.c.bf16 %v1948_v63, %v1948_v63  ;;  %v2219_v60 = vpack.c.bf16 %v1949_v0, %v1949_v0  ;;  %s2947_s20 = sshll.u32 %s3789_s19, 4  ;;  %vm2940_vm6 = vcmask 58368   ;;  %s2948_s20 = int_to_ptr.vmem [resolvable:$true] %s2947_s20 }
 0x4d0   :  { %v3673_v18 = vld [vmem:[#allocation3 + $0x50] sm:$0xff]  ;;  %v3688_v36 = vld [vmem:[#allocation3 + $0x140] sm:$0xff]  ;;  %v3692_v28 = vld [vmem:[#allocation3 + $0x28] sm:$0xff]  ;;  %v2269_v3 = vpack.c.bf16 %v1950_v21, %v1950_v21  ;;  %v2319_v44 = vpack.c.bf16 %v1951_v42, %v1951_v42 }
 0x4d1   :  { %2021 = vmatpush.bf16.msra.mxu1 %v3675_v51  ;;  %2061 = vmatpush.bf16.msrb.mxu2 %v3671_v48  ;;  %v3669_v9 = vld [vmem:[#allocation3 + $0xb0] sm:$0xff]  ;;  %v3683_v26 = vld [vmem:[#allocation3 + $0x108] sm:$0xff]  ;;  %v3687_v38 = vld [vmem:[#allocation3 + $0x138] sm:$0xff]  ;;  %v1952_v48 = vrot.slane %v4784_v59, 2 }
 0x4d2   :  { %2110 = vmatpush.bf16.msrb.mxu3 %v3679_v4  ;;  %v3691_v17 = vld [vmem:[#allocation3 + $0x1b8] sm:$0xff]  ;;  %v3682_v58 = vld [vmem:[#allocation3 + $0x150] sm:$0xff]  ;;  %v3686_v45 = vld [vmem:[#allocation3 + $0x188] sm:$0xff]  ;;  %v1953_v4 = vrot.slane %v4784_v59, 4 }
 0x4d3   :  { %v3690_v11 = vld [vmem:[#allocation3 + $0x1a8] sm:$0xff]  ;;  %v3681_v19 = vld [vmem:[#allocation3 + $0x120] sm:$0xff]  ;;  %v3696_v20 = vld [vmem:[#allocation3 + $0x30] sm:$0xff] }
 0x4d4   :  { %v3685_v23 = vld [vmem:[#allocation3 + $0xe0] sm:$0xff]  ;;  %v3700_v13 = vld [vmem:[#allocation3 + $0x8] sm:$0xff]  ;;  %v3699_v7 = vld [vmem:[#allocation3 + $0xf0] sm:$0xff] }
 0x4d5   :  { %2022 = vmatpush.bf16.msra.mxu1 %v3674_v49  ;;  %2062 = vmatpush.bf16.msrb.mxu2 %v3670_v62  ;;  %v3689_v29 = vld [vmem:[#allocation3 + $0x80] sm:$0xff]  ;;  %v3704_v16 = vld [vmem:[#allocation3 + $0xc8] sm:$0xff]  ;;  %v3694_v25 = vld [vmem:[#allocation3 + $0xf8] sm:$0xff] }
 0x4d6   :  { %2111 = vmatpush.bf16.msrb.mxu3 %v3678_v53  ;;  %v3695_v10 = vld [vmem:[#allocation3 + $0x160] sm:$0xff]  ;;  %v3702_v2 = vld [vmem:[#allocation3 + $0x1d0] sm:$0xff]  ;;  %v3693_v30 = vld [vmem:[#allocation3 + $0x1e8] sm:$0xff]  ;;  %v1954_v53 = vrot.slane %v4784_v59, 6 }
 0x4d7   :  { %v3703_v33 = vld [vmem:[#allocation3 + $0x100] sm:$0xff]  ;;  %v3701_v31 = vld [vmem:[#allocation3 + $0x148] sm:$0xff]  ;;  %v3712_v40 = vld [vmem:[#allocation3 + $0x78] sm:$0xff] }
 0x4d8   :  { %v3698_v15 = vld [vmem:[#allocation3] sm:$0xff]  ;;  %v3708_v61 = vld [vmem:[#allocation3 + $0x128] sm:$0xff]  ;;  %v3716_v41 = vld [vmem:[#allocation3 + $0xd0] sm:$0xff] }
 0x4d9   :  { %2023 = vmatpush.bf16.msra.mxu1 %v3673_v18  ;;  %2063 = vmatpush.bf16.msrb.mxu2 %v3669_v9  ;;  %v3697_v24 = vld [vmem:[#allocation3 + $0x1e0] sm:$0xff]  ;;  %v3711_v6 = vld [vmem:[#allocation3 + $0xe8] sm:$0xff]  ;;  %v3715_v22 = vld [vmem:[#allocation3 + $0x1d8] sm:$0xff]  ;;  %v2419_v18 = vpack.c.bf16 %v1952_v48, %v1952_v48  ;;  %v2469_v9 = vpack.c.bf16 %v1953_v4, %v1953_v4 }
 0x4da   :  { %2112 = vmatpush.bf16.msrb.mxu3 %v3677_v5  ;;  %v3707_v57 = vld [vmem:[#allocation3 + $0x20] sm:$0xff]  ;;  %v3706_v12 = vld [vmem:[#allocation3 + $0x1f8] sm:$0xff]  ;;  %v3710_v54 = vld [vmem:[#allocation3 + $0x1f0] sm:$0xff]  ;;  %v2519_v5 = vpack.c.bf16 %v1954_v53, %v1954_v53 }
 0x4db   :  { %v3714_v52 = vld [vmem:[#allocation3 + $0x90] sm:$0xff]  ;;  %v3705_v37 = vld [vmem:[#allocation3 + $0x40] sm:$0xff]  ;;  %v3720_v43 = vld [vmem:[#allocation3 + $0x1c8] sm:$0xff] }
 0x4dc   :  { %3296 = vmatmul.msk.bf16.vlgmr.msra.gmra.mxu1 %vm2012_vm5, %v1979_v46  ;;  %3313 = vmatmul.msk.bf16.vlgmr.msrb.gmra.mxu2 %vm2012_vm5, %v1970_v34  ;;  %v3709_v39 = vld [vmem:[#allocation3 + $0x1a0] sm:$0xff]  ;;  %v3724_v55 = vld [vmem:[#allocation3 + $0x190] sm:$0xff]  ;;  %v3719_v49 = vld [vmem:[#allocation3 + $0xa8] sm:$0xff] }
 0x4dd   :  { %2159 = vmatpush.bf16.msrb.mxu1 %v3684_v50  ;;  %2209 = vmatpush.bf16.msra.mxu2 %v3688_v36  ;;  %v3713_v56 = vld [vmem:[#allocation3 + $0x70] sm:$0xff]  ;;  %v3728_v51 = vld [vmem:[#allocation3 + $0x1c0] sm:$0xff]  ;;  %v3723_v62 = vld [vmem:[#allocation3 + $0x68] sm:$0xff] }
 0x4de   :  { %2259 = vmatpush.bf16.msra.mxu3 %v3692_v28  ;;  %v3727_v32 = vld [vmem:[#allocation3 + $0xc0] sm:$0xff]  ;;  %v3718_v1 = vld [vmem:[#allocation3 + $0x88] sm:$0xff]  ;;  %v3722_v50 = vld [vmem:[#allocation3 + $0x178] sm:$0xff] }
 0x4df   :  { %3330 = vmatmul.msk.bf16.vlgmr.msrb.gmra.mxu3 %vm2012_vm5, %v2069_v14  ;;  %v3726_v36 = vld [vmem:[#allocation3 + $0x38] sm:$0xff]  ;;  %v3721_v28 = vld [vmem:[#allocation3 + $0x170] sm:$0xff]  ;;  %v3732_v46 = vld [vmem:[#allocation3 + $0xa0] sm:$0xff] }
 0x4e0   :  { %v3717_v59 = vld [vmem:[#allocation3 + $0xb8] sm:$0xff]  ;;  %v3747_v48 = vld [vmem:[%s4893_s9 + $0x30] sm:$0xff]  ;;  %v3746_v53 = vld [vmem:[%s4893_s9 + $0x28] sm:$0xff] }
 0x4e1   :  { %2160 = vmatpush.bf16.msrb.mxu1 %v3683_v26  ;;  %2210 = vmatpush.bf16.msra.mxu2 %v3687_v38  ;;  %v3725_v34 = vld [vmem:[#allocation3 + $0x198] sm:$0xff]  ;;  %v1955_v26 = vrot.slane %v4786_v47, 2  ;;  %v1956_v38 = vrot.slane %v4786_v47, 4 }
 0x4e2   :  { %2260 = vmatpush.bf16.msra.mxu3 %v3691_v17  ;;  %v3731_v14 = vld [vmem:[#allocation3 + $0x58] sm:$0xff]  ;;  %v3730_v17 = vld [vmem:[#allocation3 + $0x10] sm:$0xff] }
 0x4e3   :  { %v3736_v21 = vld [vmem:[%s4891_s7 + $0x18] sm:$0xff] }
 0x4e5   :  { %2161 = vmatpush.bf16.msrb.mxu1 %v3682_v58  ;;  %2211 = vmatpush.bf16.msra.mxu2 %v3686_v45  ;;  %v2569_v58 = vpack.c.bf16 %v4786_v47, %v4786_v47  ;;  %v2619_v45 = vpack.c.bf16 %v1955_v26, %v1955_v26 }
 0x4e6   :  { %2261 = vmatpush.bf16.msra.mxu3 %v3690_v11  ;;  %v2669_v11 = vpack.c.bf16 %v1956_v38, %v1956_v38 }
 0x4e9   :  { %2162 = vmatpush.bf16.msrb.mxu1 %v3681_v19  ;;  %2212 = vmatpush.bf16.msra.mxu2 %v3685_v23  ;;  %v3729_v19 = vld [vmem:[#allocation3 + $0x158] sm:$0xff]  ;;  %v1957_v23 = vrot.slane %v4786_v47, 6  ;;  %v3739_v47 = vld [vmem:[%s4891_s7 + $0x30] sm:$0xff] }
 0x4ea   :  { %2262 = vmatpush.bf16.msra.mxu3 %v3689_v29 }
 0x4eb   :  { %v2719_v29 = vpack.c.bf16 %v1957_v23, %v1957_v23 }
 0x4ec   :  { %3347 = vmatmul.msk.bf16.vlgmr.msrb.gmra.mxu1 %vm2012_vm5, %v2119_v27  ;;  %3364 = vmatmul.msk.bf16.vlgmr.msra.gmra.mxu2 %vm2012_vm5, %v2169_v8 }
 0x4ed   :  { %2309 = vmatpush.bf16.msra.mxu1 %v3696_v20  ;;  %2359 = vmatpush.bf16.msrb.mxu2 %v3700_v13 }
 0x4ee   :  { %2409 = vmatpush.bf16.msrb.mxu3 %v3704_v16 }
 0x4ef   :  { %3381 = vmatmul.msk.bf16.vlgmr.msra.gmra.mxu3 %vm2012_vm5, %v2219_v60 }
 0x4f1   :  { %2310 = vmatpush.bf16.msra.mxu1 %v3695_v10  ;;  %2360 = vmatpush.bf16.msrb.mxu2 %v3699_v7 }
 0x4f2   :  { %2410 = vmatpush.bf16.msrb.mxu3 %v3703_v33  ;;  %v3740_v33 = vld [vmem:[%s4891_s7 + $0x38] sm:$0xff] }
 0x4f5   :  { %2311 = vmatpush.bf16.msra.mxu1 %v3694_v25  ;;  %2361 = vmatpush.bf16.msrb.mxu2 %v3698_v15 }
 0x4f6   :  { %2411 = vmatpush.bf16.msrb.mxu3 %v3702_v2 }
 0x4f9   :  { %2312 = vmatpush.bf16.msra.mxu1 %v3693_v30  ;;  %2362 = vmatpush.bf16.msrb.mxu2 %v3697_v24  ;;  %v3738_v30 = vld [vmem:[%s4891_s7 + $0x28] sm:$0xff]  ;;  %v3737_v24 = vld [vmem:[%s4891_s7 + $0x20] sm:$0xff] }
 0x4fa   :  { %2412 = vmatpush.bf16.msrb.mxu3 %v3701_v31 }
 0x4fc   :  { %3398 = vmatmul.msk.bf16.vlgmr.msra.gmra.mxu1 %vm2012_vm5, %v2269_v3  ;;  %3415 = vmatmul.msk.bf16.vlgmr.msrb.gmra.mxu2 %vm2012_vm5, %v2319_v44 }
 0x4fd   :  { %2459 = vmatpush.bf16.msrb.mxu1 %v3708_v61  ;;  %2509 = vmatpush.bf16.msra.mxu2 %v3712_v40 }
 0x4fe   :  { %2559 = vmatpush.bf16.msra.mxu3 %v3716_v41  ;;  %v3735_v41 = vld [vmem:[%s4891_s7 + $0x10] sm:$0xff] }
 0x4ff   :  { %3432 = vmatmul.msk.bf16.vlgmr.msrb.gmra.mxu3 %vm2012_vm5, %v2369_v35 }
 0x501   :  { %2460 = vmatpush.bf16.msrb.mxu1 %v3707_v57  ;;  %2510 = vmatpush.bf16.msra.mxu2 %v3711_v6 }
 0x502   :  { %2560 = vmatpush.bf16.msra.mxu3 %v3715_v22  ;;  %v3734_v22 = vld [vmem:[%s4891_s7 + $0x8] sm:$0xff] }
 0x505   :  { %2461 = vmatpush.bf16.msrb.mxu1 %v3706_v12  ;;  %2511 = vmatpush.bf16.msra.mxu2 %v3710_v54  ;;  %v3733_v54 = vld [vmem:[%s4891_s7] sm:$0xff] }
 0x506   :  { %2561 = vmatpush.bf16.msra.mxu3 %v3714_v52 }
 0x509   :  { %2462 = vmatpush.bf16.msrb.mxu1 %v3705_v37  ;;  %2512 = vmatpush.bf16.msra.mxu2 %v3709_v39 }
 0x50a   :  { %2562 = vmatpush.bf16.msra.mxu3 %v3713_v56  ;;  %v3748_v56 = vld [vmem:[%s4893_s9 + $0x38] sm:$0xff] }
 0x50c   :  { %3449 = vmatmul.msk.bf16.vlgmr.msrb.gmra.mxu1 %vm2012_vm5, %v2419_v18  ;;  %3466 = vmatmul.msk.bf16.vlgmr.msra.gmra.mxu2 %vm2012_vm5, %v2469_v9 }
 0x50d   :  { %2609 = vmatpush.bf16.msra.mxu1 %v3720_v43  ;;  %2659 = vmatpush.bf16.msrb.mxu2 %v3724_v55 }
 0x50e   :  { %2709 = vmatpush.bf16.msrb.mxu3 %v3728_v51 }
 0x50f   :  { %3483 = vmatmul.msk.bf16.vlgmr.msra.gmra.mxu3 %vm2012_vm5, %v2519_v5  ;;  %v3745_v5 = vld [vmem:[%s4893_s9 + $0x20] sm:$0xff] }
 0x511   :  { %2610 = vmatpush.bf16.msra.mxu1 %v3719_v49  ;;  %2660 = vmatpush.bf16.msrb.mxu2 %v3723_v62 }
 0x512   :  { %2710 = vmatpush.bf16.msrb.mxu3 %v3727_v32 }
 0x515   :  { %2611 = vmatpush.bf16.msra.mxu1 %v3718_v1  ;;  %2661 = vmatpush.bf16.msrb.mxu2 %v3722_v50 }
 0x516   :  { %2711 = vmatpush.bf16.msrb.mxu3 %v3726_v36 }
 0x519   :  { %2612 = vmatpush.bf16.msra.mxu1 %v3717_v59  ;;  %2662 = vmatpush.bf16.msrb.mxu2 %v3721_v28  ;;  %v3744_v59 = vld [vmem:[%s4893_s9 + $0x18] sm:$0xff] }
 0x51a   :  { %2712 = vmatpush.bf16.msrb.mxu3 %v3725_v34 }
 0x51c   :  { %3500 = vmatmul.msk.bf16.vlgmr.msra.gmra.mxu1 %vm2012_vm5, %v2569_v58  ;;  %3517 = vmatmul.msk.bf16.vlgmr.msrb.gmra.mxu2 %vm2012_vm5, %v2619_v45  ;;  %v3756_v58 = vld [vmem:[%s4890_s6] ss:$0 sm:$0xff] }
 0x51d   :  { %2759 = vmatpush.bf16.msrb.mxu1 %v3732_v46  ;;  %2844 = vmatpush.bf16.msra.mxu2 %v3740_v33 }
 0x51e   :  { %2927 = vmatpush.bf16.msra.mxu3 %v3748_v56 }
 0x51f   :  { %3534 = vmatmul.msk.bf16.vlgmr.msrb.gmra.mxu3 %vm2012_vm5, %v2669_v11 }
 0x521   :  { %2760 = vmatpush.bf16.msrb.mxu1 %v3731_v14  ;;  %2845 = vmatpush.bf16.msra.mxu2 %v3739_v47  ;;  %v3743_v14 = vld [vmem:[%s4893_s9 + $0x10] sm:$0xff] }
 0x522   :  { %2928 = vmatpush.bf16.msra.mxu3 %v3747_v48 }
 0x525   :  { %2761 = vmatpush.bf16.msrb.mxu1 %v3730_v17  ;;  %2846 = vmatpush.bf16.msra.mxu2 %v3738_v30 }
 0x526   :  { %2929 = vmatpush.bf16.msra.mxu3 %v3746_v53 }
 0x529   :  { %2762 = vmatpush.bf16.msrb.mxu1 %v3729_v19  ;;  %2847 = vmatpush.bf16.msra.mxu2 %v3737_v24 }
 0x52a   :  { %2930 = vmatpush.bf16.msra.mxu3 %v3745_v5 }
 0x52c   :  { %3551 = vmatmul.msk.bf16.vlgmr.msrb.gmra.mxu1 %vm2012_vm5, %v2719_v29 }
 0x52d   :  { %2848 = vmatpush.bf16.msra.mxu2 %v3736_v21 }
 0x52e   :  { %2931 = vmatpush.bf16.msra.mxu3 %v3744_v59 }
 0x531   :  { %2849 = vmatpush.bf16.msra.mxu2 %v3735_v41 }
 0x532   :  { %2932 = vmatpush.bf16.msra.mxu3 %v3743_v14 }
 0x535   :  { %2850 = vmatpush.bf16.msra.mxu2 %v3734_v22 }
 0x539   :  { %2851 = vmatpush.bf16.msra.mxu2 %v3733_v54 }
 0x559   :  { %v2025_v63 = vpop.f32.mrf.mxu1 }
 0x55f   :  { %v2065_v20 = vpop.f32.mrf.mxu2 }
 0x560   :  { %v2066_v42 = vadd.f32 %v2065_v20, %v2025_v63  ;;  %v3742_v20 = vld [vmem:[%s4893_s9 + $0x8] sm:$0xff] }
 0x561   :  { %v2027_v0 = vpop.f32.mrf.mxu1  ;;  %2933 = vmatpush.bf16.msra.mxu3 %v3742_v20 }
 0x562   :  { %v2114_v13 = vpop.f32.mrf.mxu3  ;;  %v3757_v0 = vld [vmem:[%s4892_s8] ss:$0 sm:$0xff] }
 0x563   :  { %v2118_v6 = vadd.f32 %v2114_v13, %v2066_v42  ;;  %v3741_v13 = vld [vmem:[%s4893_s9] sm:$0xff]  ;;  %s2949_s9 = sshll.u32 %s4895_s11, 4  ;;  %s2950_s9 = int_to_ptr.hbm [resolvable:$true] %s2949_s9 }
 0x565   :  { %2934 = vmatpush.bf16.msra.mxu3 %v3741_v13 }
 0x567   :  { %v2067_v16 = vpop.f32.mrf.mxu2 }
 0x569   :  { %v2164_v8 = vpop.f32.mrf.mxu1 }
 0x56a   :  { %v2116_v27 = vpop.f32.mrf.mxu3  ;;  %v2168_v35 = vadd.f32 %v2164_v8, %v2118_v6 }
 0x56f   :  { %v2214_v60 = vpop.f32.mrf.mxu2 }
 0x570   :  { %v2218_v12 = vadd.f32 %v2214_v60, %v2168_v35 }
 0x571   :  { %v2166_v7 = vpop.f32.mrf.mxu1 }
 0x572   :  { %v2264_v10 = vpop.f32.mrf.mxu3  ;;  %v3758_v7 = vld [vmem:[%s4894_s10] ss:$0 sm:$0xff] }
 0x573   :  { %v2268_v37 = vadd.f32 %v2264_v10, %v2218_v12 }
 0x577   :  { %v2216_v25 = vpop.f32.mrf.mxu2 }
 0x579   :  { %v2314_v2 = vpop.f32.mrf.mxu1 }
 0x57a   :  { %v2266_v15 = vpop.f32.mrf.mxu3  ;;  %v2318_v55 = vadd.f32 %v2314_v2, %v2268_v37 }
 0x57f   :  { %v2364_v31 = vpop.f32.mrf.mxu2 }
 0x580   :  { %v2368_v51 = vadd.f32 %v2364_v31, %v2318_v55 }
 0x581   :  { %v2316_v40 = vpop.f32.mrf.mxu1 }
 0x582   :  { %v2414_v61 = vpop.f32.mrf.mxu3 }
 0x583   :  { %v2418_v49 = vadd.f32 %v2414_v61, %v2368_v51 }
 0x587   :  { %v2366_v57 = vpop.f32.mrf.mxu2 }
 0x589   :  { %v2464_v44 = vpop.f32.mrf.mxu1 }
 0x58a   :  { %v2416_v3 = vpop.f32.mrf.mxu3  ;;  %v2468_v18 = vadd.f32 %v2464_v44, %v2418_v49 }
 0x58f   :  { %v2514_v52 = vpop.f32.mrf.mxu2 }
 0x590   :  { %v2518_v9 = vadd.f32 %v2514_v52, %v2468_v18 }
 0x591   :  { %v2466_v43 = vpop.f32.mrf.mxu1 }
 0x592   :  { %v2564_v39 = vpop.f32.mrf.mxu3 }
 0x593   :  { %v2568_v50 = vadd.f32 %v2564_v39, %v2518_v9 }
 0x597   :  { %v2516_v4 = vpop.f32.mrf.mxu2 }
 0x599   :  { %v2614_v32 = vpop.f32.mrf.mxu1 }
 0x59a   :  { %v2566_v62 = vpop.f32.mrf.mxu3  ;;  %v2618_v46 = vadd.f32 %v2614_v32, %v2568_v50 }
 0x59f   :  { %v2664_v1 = vpop.f32.mrf.mxu2 }
 0x5a0   :  { %v2668_v34 = vadd.f32 %v2664_v1, %v2618_v46 }
 0x5a1   :  { %v2616_v28 = vpop.f32.mrf.mxu1 }
 0x5a2   :  { %v2714_v36 = vpop.f32.mrf.mxu3 }
 0x5a3   :  { %v2718_v38 = vadd.f32 %v2714_v36, %v2668_v34 }
 0x5a7   :  { %v2666_v26 = vpop.f32.mrf.mxu2 }
 0x5a9   :  { %v2764_v45 = vpop.f32.mrf.mxu1 }
 0x5aa   :  { %v2716_v17 = vpop.f32.mrf.mxu3  ;;  %v2768_v11 = vadd.f32 %v2764_v45, %v2718_v38 }
 0x5ac   :  { %v2773_v19 = vadd.f32 %v3756_v58, %v2768_v11 }
 0x5ae   :  { %v2774_v23 = vmax.f32 %v2773_v19, 0.0 }
 0x5b0   :  { %v2775_v29 = vpack.c.bf16 %v2774_v23, %v2774_v23 }
 0x5b1   :  { %v2766_v63 = vpop.f32.mrf.mxu1 }
 0x5b2   :  { %2852 = vmatmul.bf16.vlgmr.msra.gmra.mxu2 %v2775_v29 }
 0x635   :  { %v2853_v16 = vpop.f32.mrf.mxu2 }
 0x636   :  { %v2854_v27 = vadd.f32 %v3757_v0, %v2853_v16 }
 0x638   :  { %v2857_v8 = vmax.f32 %v2854_v27, 0.0 }
 0x63a   :  { %v2858_v60 = vpack.c.bf16 %v2857_v8, %v2857_v8 }
 0x63c   :  { %2935 = vmatmul.bf16.vlgmr.msra.gmra.mxu3 %v2858_v60 }
 0x63d   :  { %v2855_v10 = vpop.f32.mrf.mxu2 }
 0x6bf   :  { %v2936_v33 = vpop.f32.mrf.mxu3 }
 0x6c0   :  { %v2937_v47 = vadd.f32 %v3758_v7, %v2936_v33 }
 0x6c2   :  { %2941 = vst.msk [vmem:[#allocation5] sm:$0x3] %vm2940_vm6, %v2937_v47 }
 0x6c3   :  { %2952 = dma.vmem_to_hbm [thread:$0]  %s2948_s20, 32, %s2950_s9, [#allocation6]  }
 0x6c7   :  { %v2938_v25 = vpop.f32.mrf.mxu3 }
 0x6c8   :  { %3785 = dma.done.wait [#allocation6], 32  }
 0x6c9   :  { %3786 = vsyncadd [#allocation6], 4294967264 }
 0x6ca   :  { %2957 = vsyncpa [#allocation6], 1 }
 0x6cb   :  { %2958 = vsyncmov [#allocation4] }
 0x6ce   :  { %s2959_s8 = vpop.sfrf %2958 }
 0x6cf   :  { %p3616_p0 = scmp.ne.s32.totalorder %s2959_s8, 0 }
 0x6d1   :  { %2963 = shalt.err (%p3616_p0)  }

</bundles_post_ra>
